<compile_context>
chip_gen: v7x
topology: tpu7x:2x2x1
jax: 0.10.0
libtpu: 0.0.40
codegen_flags: <defaults>
</compile_context>

<pallas_src>
import math
import functools

import jax
import jax.numpy as jnp
from jax import lax
from jax.experimental import pallas as pl
from jax.experimental.pallas import tpu as pltpu


def _layer_norm_f32(x, a, b, n_feat, eps=1e-6):
    """a * (x - mean) / (std + eps) + b with unbiased std (N-1), torch.std semantics.

    Two-pass variance for accuracy; `inv` stays a (rows,1) broadcast and `a` a (1,D)
    broadcast so no (rows, D) temporary is materialized for a*inv.
    """
    mean = jnp.sum(x, axis=-1, keepdims=True) * (1.0 / n_feat)
    xm = x - mean
    var = jnp.sum(xm * xm, axis=-1, keepdims=True) * (1.0 / (n_feat - 1))
    inv = 1.0 / (jnp.sqrt(var) + eps)
    return (xm * inv) * a + b


def encoder_layer_kernel(
    x_ref, mask_ref,
    a1_ref, b1_ref,
    wq_ref, bq_ref, wk_ref, bk_ref, wv_ref, bv_ref, wo_ref, bo_ref,
    a2_ref, b2_ref,
    w1_ref, bw1_ref, w2_ref, bw2_ref,
    out_ref,
    k_cache, v_cache, o_heads,
    *, d_model, num_heads, q_block, cache_kv,
):
    f32, bf16 = jnp.float32, jnp.bfloat16
    d_k = d_model // num_heads
    scale = 1.0 / math.sqrt(d_k)
    qi = pl.program_id(1)

    a1, b1 = a1_ref[...], b1_ref[...]

    def project_kv():
        x_kv = x_ref[0].astype(f32)                                # (L, D)
        y_kv = _layer_norm_f32(x_kv, a1, b1, d_model).astype(bf16)
        k_cache[...] = (jnp.dot(y_kv, wk_ref[...], preferred_element_type=f32)
                        + bk_ref[...]).astype(bf16)
        v_cache[...] = (jnp.dot(y_kv, wv_ref[...], preferred_element_type=f32)
                        + bv_ref[...]).astype(bf16)

    if cache_kv:
        # K/V computed once per batch element; scratch persists across the
        # "arbitrary" query-tile axis.
        @pl.when(qi == 0)
        def _():
            project_kv()
    else:
        project_kv()

    # Query tile is a sub-block of the already-resident (L, D) sequence block:
    # no duplicated query input / HBM read.
    q_start = pl.multiple_of(qi * q_block, q_block)
    x_q = x_ref[0, pl.ds(q_start, q_block), :].astype(f32)         # (TQ, D) residual

    mask = mask_ref[0].astype(f32)                                 # (1, L)
    mask_bias = (mask - 1.0) * 1e9                                 # 0 keep / -1e9 masked

    # ---- sublayer 0: multi-head self-attention on LN1(x), residual add ----
    y_q = _layer_norm_f32(x_q, a1, b1, d_model).astype(bf16)
    # Softmax scale folded into Q: one (TQ, D) multiply instead of H (TQ, L) passes.
    q = ((jnp.dot(y_q, wq_ref[...], preferred_element_type=f32) + bq_ref[...])
         * scale).astype(bf16)
    k = k_cache[...]
    v = v_cache[...]

    # Static unroll over heads (H is small). Each head's output is stored to the
    # o_heads scratch at a static lane offset; the ordered stores keep per-head
    # (TQ, L) score/prob intermediates from staying live across heads.
    for h in range(num_heads):
        sl = slice(h * d_k, (h + 1) * d_k)
        qh, kh, vh = q[:, sl], k[:, sl], v[:, sl]                  # (TQ,dk)(L,dk)(L,dk)
        # Contract on the shared last dim: no explicit kh.T per head.
        s = lax.dot_general(qh, kh, (((1,), (1,)), ((), ())),
                            preferred_element_type=f32)            # (TQ, L)
        s = s + mask_bias
        m = jnp.max(s, axis=-1, keepdims=True)
        p = jnp.exp(s - m)                                         # unnormalized probs
        denom = jnp.sum(p, axis=-1, keepdims=True)                 # (TQ, 1)
        o_h = jnp.dot(p.astype(bf16), vh, preferred_element_type=f32)   # (TQ, dk)
        # Deferred softmax normalization on the (TQ, dk) head output.
        o_h = o_h * pl.reciprocal(denom, approx=False)
        o_heads[:, sl] = o_h.astype(bf16)

    # Single full-depth (TQ, D) @ (D, D) output projection (full MXU contraction
    # depth instead of H shallow d_k-deep matmuls).
    attn = jnp.dot(o_heads[...], wo_ref[...], preferred_element_type=f32) + bo_ref[...]
    x1 = x_q + attn                                                # dropout = identity

    # ---- sublayer 1: position-wise feed-forward on LN2(x1), residual add ----
    y2 = _layer_norm_f32(x1, a2_ref[...], b2_ref[...], d_model).astype(bf16)
    h1 = jnp.dot(y2, w1_ref[...], preferred_element_type=f32) + bw1_ref[...]
    h1 = jnp.maximum(h1, 0.0).astype(bf16)
    ff = jnp.dot(h1, w2_ref[...], preferred_element_type=f32) + bw2_ref[...]

    out_ref[0] = (x1 + ff).astype(out_ref.dtype)


def _tpu_vmem_capacity_bytes():
    try:
        return int(pltpu.get_tpu_info().vmem_capacity_bytes)
    except Exception:
        return 128 * 1024 * 1024


def _pick_q_block(L, vmem_cap):
    # Small-VMEM chips (v7x: ~64 MiB/TC) -> cap query tile at 256; v5e/v6e
    # (128 MiB) take 512-wide tiles to amortize per-grid-step overhead.
    cands = (512, 256, 128) if vmem_cap >= 100 * 1024 * 1024 else (256, 128)
    for c in cands:
        if L % c == 0:
            return c
    return L


def _vmem_limit_bytes(L, D, d_ff, q_block, vmem_cap):
    f32b, bf16b = 4, 2
    need = (
        2 * L * D * f32b                       # double-buffered (1, L, D) x block
        + 2 * q_block * D * f32b               # double-buffered output tile
        + 2 * 8 * L * f32b                     # mask block (sublane padded)
        + (4 * D * D + 2 * D * d_ff) * bf16b   # single-buffered bf16 weights
        + (10 * D + d_ff) * f32b               # LN params + biases
        + 2 * L * D * bf16b + q_block * D * bf16b     # K/V caches + head scratch
        + 6 * L * D * f32b                     # LN / projection intermediates
        + 4 * q_block * L * f32b               # per-head score/prob tiles (+ slack)
        + 2 * q_block * d_ff * f32b            # FFN hidden intermediates
    )
    return int(min(0.9 * vmem_cap, max(1.5 * need, 32 * 1024 * 1024)))


def encoder_layer(x, mask, params, *, num_heads, q_block=None):
    """x: (B, L, D) f32, mask: (B, 1, L) f32 (1 = keep, 0 = masked)."""
    B, L, D = x.shape
    d_ff = params["w1T"].shape[1]
    vmem_cap = _tpu_vmem_capacity_bytes()

    if q_block is None:
        q_block = _pick_q_block(L, vmem_cap)
    assert L % q_block == 0
    nq = L // q_block

    # Cache K/V across query tiles (qi axis becomes "arbitrary"). On a small-VMEM
    # 2-TC chip (v7x) with B == 1 keep qi "parallel" instead so a core doesn't idle.
    is_small_vmem = vmem_cap < 100 * 1024 * 1024
    cache_kv = (nq > 1) and (B >= 2 or not is_small_vmem)

    param_list = [
        params["a1"], params["b1"],
        params["wqT"], params["bq"], params["wkT"], params["bk"],
        params["wvT"], params["bv"], params["woT"], params["bo"],
        params["a2"], params["b2"],
        params["w1T"], params["bw1"], params["w2T"], params["bw2"],
    ]

    in_specs = [
        # Full sequence block: source of both K/V and the in-kernel query slice.
        pl.BlockSpec((1, L, D), lambda b, qi: (b, 0, 0)),
        pl.BlockSpec((1, 1, L), lambda b, qi: (b, 0, 0)),          # key mask
    ] + [
        # Grid-resident parameters: constant index map -> single buffer is enough.
        pl.BlockSpec(p.shape, lambda b, qi, nd=p.ndim: (0,) * nd,
                     pipeline_mode=pl.Buffered(1))
        for p in param_list
    ]

    kernel = functools.partial(
        encoder_layer_kernel, d_model=D, num_heads=num_heads,
        q_block=q_block, cache_kv=cache_kv)

    return pl.pallas_call(
        kernel,
        out_shape=jax.ShapeDtypeStruct((B, L, D), x.dtype),
        grid_spec=pltpu.PrefetchScalarGridSpec(
            num_scalar_prefetch=0,
            grid=(B, nq),
            in_specs=in_specs,
            out_specs=pl.BlockSpec((1, q_block, D), lambda b, qi: (b, qi, 0)),
            scratch_shapes=[
                pltpu.VMEM((L, D), jnp.bfloat16),        # K cache
                pltpu.VMEM((L, D), jnp.bfloat16),        # V cache
                pltpu.VMEM((q_block, D), jnp.bfloat16),  # concatenated head outputs
            ],
        ),
        compiler_params=pltpu.CompilerParams(
            dimension_semantics=("parallel",
                                 "arbitrary" if cache_kv else "parallel"),
            vmem_limit_bytes=_vmem_limit_bytes(L, D, d_ff, q_block, vmem_cap),
        ),
    )(x, mask, *param_list)


def init_params(key, d_model, d_ff, num_heads):
    """Deterministic synthetic parameters.

    Linear weights are pre-transposed to (in, out) and stored bf16 (MXU operands);
    LayerNorm params and biases stay f32 (elementwise / VPU path). The output
    projection is stored unsplit (D, D) so the kernel does a single full-depth matmul.
    """
    del num_heads  # only the unsplit (D, D) wo is stored now
    ks = jax.random.split(key, 16)
    std = 0.02
    f32, bf16 = jnp.float32, jnp.bfloat16

    def lin(k, fan_in, fan_out):
        return (std * jax.random.normal(k, (fan_in, fan_out), f32)).astype(bf16)

    def vec(k, n, s=0.02):
        return s * jax.random.normal(k, (1, n), f32)

    return {
        "a1": 1.0 + vec(ks[0], d_model, 0.1),
        "b1": vec(ks[1], d_model, 0.1),
        "wqT": lin(ks[2], d_model, d_model), "bq": vec(ks[3], d_model),
        "wkT": lin(ks[4], d_model, d_model), "bk": vec(ks[5], d_model),
        "wvT": lin(ks[6], d_model, d_model), "bv": vec(ks[7], d_model),
        "woT": lin(ks[8], d_model, d_model), "bo": vec(ks[9], d_model),
        "a2": 1.0 + vec(ks[10], d_model, 0.1),
        "b2": vec(ks[11], d_model, 0.1),
        "w1T": lin(ks[12], d_model, d_ff), "bw1": vec(ks[13], d_ff),
        "w2T": lin(ks[14], d_ff, d_model), "bw2": vec(ks[15], d_model),
    }


def encoder_layer_ref(x, mask, params, *, num_heads):
    """Pure-JAX f32 reference matching the torch module (eval mode)."""
    f32 = jnp.float32
    B, L, D = x.shape
    H = num_heads
    d_k = D // H

    def ln(t, a, b, eps=1e-6):
        mean = jnp.mean(t, axis=-1, keepdims=True)
        var = jnp.sum((t - mean) ** 2, axis=-1, keepdims=True) / (D - 1)
        return a * (t - mean) / (jnp.sqrt(var) + eps) + b

    wq = params["wqT"].astype(f32)
    wk = params["wkT"].astype(f32)
    wv = params["wvT"].astype(f32)
    wo = params["woT"].astype(f32)
    w1 = params["w1T"].astype(f32)
    w2 = params["w2T"].astype(f32)

    y = ln(x, params["a1"][0], params["b1"][0])
    q = y @ wq + params["bq"][0]
    k = y @ wk + params["bk"][0]
    v = y @ wv + params["bv"][0]

    def split(t):
        return t.reshape(B, L, H, d_k).transpose(0, 2, 1, 3)

    qh, kh, vh = split(q), split(k), split(v)
    scores = jnp.einsum("bhqd,bhkd->bhqk", qh, kh) / math.sqrt(d_k)
    scores = jnp.where(mask[:, None, :, :] == 0.0, -1e9, scores)
    p = jax.nn.softmax(scores, axis=-1)
    o = jnp.einsum("bhqk,bhkd->bhqd", p, vh).transpose(0, 2, 1, 3).reshape(B, L, D)
    x1 = x + (o @ wo + params["bo"][0])

    y2 = ln(x1, params["a2"][0], params["b2"][0])
    ff = jnp.maximum(y2 @ w1 + params["bw1"][0], 0.0) @ w2 + params["bw2"][0]
    return x1 + ff


if __name__ == "__main__":
    H, D, D_FF = 4, 32, 64
    key = jax.random.PRNGKey(0)
    kx, kp, kx2 = jax.random.split(key, 3)
    params = init_params(kp, D, D_FF, H)

    # Case 1: a single query tile per batch element (non-cached K/V path).
    B, L = 2, 8
    x = jax.random.normal(kx, (B, L, D), jnp.float32)
    mask = jnp.ones((B, 1, L), jnp.float32)
    mask = mask.at[1, 0, L - 1].set(0.0)
    mask = mask.at[1, 0, L - 2].set(0.0)
    out = encoder_layer(x, mask, params, num_heads=H)
    jax.block_until_ready(out)
    assert out.shape == (B, L, D)
    ref = encoder_layer_ref(x, mask, params, num_heads=H)
    err1 = float(jnp.max(jnp.abs(out.astype(jnp.float32) - ref)))
    assert err1 < 5e-2, f"case1 max abs err {err1}"

    # Case 2: multiple query tiles -> exercises the cached-K/V ("arbitrary" qi) path.
    B2, L2, QB = 2, 16, 8
    x2 = jax.random.normal(kx2, (B2, L2, D), jnp.float32)
    mask2 = jnp.ones((B2, 1, L2), jnp.float32)
    mask2 = mask2.at[0, 0, 0].set(0.0)
    mask2 = mask2.at[1, 0, L2 - 3].set(0.0)
    out2 = encoder_layer(x2, mask2, params, num_heads=H, q_block=QB)
    jax.block_until_ready(out2)
    assert out2.shape == (B2, L2, D)
    ref2 = encoder_layer_ref(x2, mask2, params, num_heads=H)
    err2 = float(jnp.max(jnp.abs(out2.astype(jnp.float32) - ref2)))
    assert err2 < 5e-2, f"case2 max abs err {err2}"

    print("KERNEL_OK")
</pallas_src>

<mosaic_0001>
module attributes {stable_mosaic.version = 11 : i64} {
  func.func @encoder_layer_kernel(%arg0: i32, %arg1: i32, %arg2: memref<1x8x32xf32, #tpu.memory_space<vmem>>, %arg3: memref<1x1x8xf32, #tpu.memory_space<vmem>>, %arg4: memref<1x32xf32, #tpu.memory_space<vmem>>, %arg5: memref<1x32xf32, #tpu.memory_space<vmem>>, %arg6: memref<32x32xbf16, #tpu.memory_space<vmem>>, %arg7: memref<1x32xf32, #tpu.memory_space<vmem>>, %arg8: memref<32x32xbf16, #tpu.memory_space<vmem>>, %arg9: memref<1x32xf32, #tpu.memory_space<vmem>>, %arg10: memref<32x32xbf16, #tpu.memory_space<vmem>>, %arg11: memref<1x32xf32, #tpu.memory_space<vmem>>, %arg12: memref<32x32xbf16, #tpu.memory_space<vmem>>, %arg13: memref<1x32xf32, #tpu.memory_space<vmem>>, %arg14: memref<1x32xf32, #tpu.memory_space<vmem>>, %arg15: memref<1x32xf32, #tpu.memory_space<vmem>>, %arg16: memref<32x64xbf16, #tpu.memory_space<vmem>>, %arg17: memref<1x64xf32, #tpu.memory_space<vmem>>, %arg18: memref<64x32xbf16, #tpu.memory_space<vmem>>, %arg19: memref<1x32xf32, #tpu.memory_space<vmem>>, %arg20: memref<1x8x32xf32, #tpu.memory_space<vmem>>, %arg21: memref<8x32xbf16, #tpu.memory_space<vmem>>, %arg22: memref<8x32xbf16, #tpu.memory_space<vmem>>, %arg23: memref<8x32xbf16, #tpu.memory_space<vmem>>) attributes {dimension_semantics = [#tpu.dimension_semantics<parallel>, #tpu.dimension_semantics<parallel>], iteration_bounds = array<i64: 2, 1>, scalar_prefetch = 0 : i64, scratch_operands = 3 : i64, tpu.core_type = #tpu.core_type<tc>, window_params = [{transform_indices = @transform_0, window_bounds = array<i64: 1, 8, 32>}, {transform_indices = @transform_1, window_bounds = array<i64: 1, 1, 8>}, {pipeline_mode = #tpu.pipeline_mode<synchronous>, transform_indices = @transform_2, window_bounds = array<i64: 1, 32>}, {pipeline_mode = #tpu.pipeline_mode<synchronous>, transform_indices = @transform_3, window_bounds = array<i64: 1, 32>}, {pipeline_mode = #tpu.pipeline_mode<synchronous>, transform_indices = @transform_4, window_bounds = array<i64: 32, 32>}, {pipeline_mode = #tpu.pipeline_mode<synchronous>, transform_indices = @transform_5, window_bounds = array<i64: 1, 32>}, {pipeline_mode = #tpu.pipeline_mode<synchronous>, transform_indices = @transform_6, window_bounds = array<i64: 32, 32>}, {pipeline_mode = #tpu.pipeline_mode<synchronous>, transform_indices = @transform_7, window_bounds = array<i64: 1, 32>}, {pipeline_mode = #tpu.pipeline_mode<synchronous>, transform_indices = @transform_8, window_bounds = array<i64: 32, 32>}, {pipeline_mode = #tpu.pipeline_mode<synchronous>, transform_indices = @transform_9, window_bounds = array<i64: 1, 32>}, {pipeline_mode = #tpu.pipeline_mode<synchronous>, transform_indices = @transform_10, window_bounds = array<i64: 32, 32>}, {pipeline_mode = #tpu.pipeline_mode<synchronous>, transform_indices = @transform_11, window_bounds = array<i64: 1, 32>}, {pipeline_mode = #tpu.pipeline_mode<synchronous>, transform_indices = @transform_12, window_bounds = array<i64: 1, 32>}, {pipeline_mode = #tpu.pipeline_mode<synchronous>, transform_indices = @transform_13, window_bounds = array<i64: 1, 32>}, {pipeline_mode = #tpu.pipeline_mode<synchronous>, transform_indices = @transform_14, window_bounds = array<i64: 32, 64>}, {pipeline_mode = #tpu.pipeline_mode<synchronous>, transform_indices = @transform_15, window_bounds = array<i64: 1, 64>}, {pipeline_mode = #tpu.pipeline_mode<synchronous>, transform_indices = @transform_16, window_bounds = array<i64: 64, 32>}, {pipeline_mode = #tpu.pipeline_mode<synchronous>, transform_indices = @transform_17, window_bounds = array<i64: 1, 32>}, {transform_indices = @transform_18, window_bounds = array<i64: 1, 8, 32>}]} {
    %c0 = arith.constant 0 : index
    %c0_0 = arith.constant 0 : index
    %0 = vector.load %arg4[%c0, %c0_0] : memref<1x32xf32, #tpu.memory_space<vmem>>, vector<1x32xf32>
    %c0_1 = arith.constant 0 : index
    %c0_2 = arith.constant 0 : index
    %1 = vector.load %arg5[%c0_1, %c0_2] : memref<1x32xf32, #tpu.memory_space<vmem>>, vector<1x32xf32>
    %c0_3 = arith.constant 0 : index
    %c0_4 = arith.constant 0 : index
    %c0_5 = arith.constant 0 : index
    %2 = vector.load %arg2[%c0_3, %c0_4, %c0_5] : memref<1x8x32xf32, #tpu.memory_space<vmem>>, vector<1x8x32xf32>
    %3 = vector.shape_cast %2 : vector<1x8x32xf32> to vector<8x32xf32>
    %cst = arith.constant dense<0.000000e+00> : vector<8xf32>
    %4 = vector.multi_reduction <add>, %3, %cst [1] : vector<8x32xf32> to vector<8xf32>
    %5 = vector.shape_cast %4 : vector<8xf32> to vector<8x1xf32>
    %cst_6 = arith.constant 3.125000e-02 : f32
    %6 = vector.broadcast %cst_6 : f32 to vector<8x1xf32>
    %7 = arith.mulf %5, %6 : vector<8x1xf32>
    %8 = vector.broadcast %7 : vector<8x1xf32> to vector<8x32xf32>
    %9 = arith.subf %3, %8 : vector<8x32xf32>
    %10 = arith.mulf %9, %9 : vector<8x32xf32>
    %cst_7 = arith.constant dense<0.000000e+00> : vector<8xf32>
    %11 = vector.multi_reduction <add>, %10, %cst_7 [1] : vector<8x32xf32> to vector<8xf32>
    %12 = vector.shape_cast %11 : vector<8xf32> to vector<8x1xf32>
    %cst_8 = arith.constant 0.0322580636 : f32
    %13 = vector.broadcast %cst_8 : f32 to vector<8x1xf32>
    %14 = arith.mulf %12, %13 : vector<8x1xf32>
    %15 = math.sqrt %14 : vector<8x1xf32>
    %cst_9 = arith.constant 9.99999997E-7 : f32
    %16 = vector.broadcast %cst_9 : f32 to vector<8x1xf32>
    %17 = arith.addf %15, %16 : vector<8x1xf32>
    %cst_10 = arith.constant 1.000000e+00 : f32
    %18 = vector.broadcast %cst_10 : f32 to vector<8x1xf32>
    %19 = arith.divf %18, %17 : vector<8x1xf32>
    %20 = vector.broadcast %19 : vector<8x1xf32> to vector<8x32xf32>
    %21 = arith.mulf %9, %20 : vector<8x32xf32>
    %22 = vector.broadcast %0 : vector<1x32xf32> to vector<8x32xf32>
    %23 = arith.mulf %21, %22 : vector<8x32xf32>
    %24 = vector.broadcast %1 : vector<1x32xf32> to vector<8x32xf32>
    %25 = arith.addf %23, %24 : vector<8x32xf32>
    %26 = arith.truncf %25 : vector<8x32xf32> to vector<8x32xbf16>
    %c0_11 = arith.constant 0 : index
    %c0_12 = arith.constant 0 : index
    %27 = vector.load %arg8[%c0_11, %c0_12] : memref<32x32xbf16, #tpu.memory_space<vmem>>, vector<32x32xbf16>
    %cst_13 = arith.constant dense<0.000000e+00> : vector<8x32xf32>
    %28 = tpu.matmul %26, %27, %cst_13 {dimension_numbers = #tpu.dot_dimension_numbers<[1], [0], [0], [1], [0, 0, 1, 1], [], []>} : vector<8x32xbf16>, vector<32x32xbf16>, vector<8x32xf32> -> vector<8x32xf32>
    %c0_14 = arith.constant 0 : index
    %c0_15 = arith.constant 0 : index
    %29 = vector.load %arg9[%c0_14, %c0_15] : memref<1x32xf32, #tpu.memory_space<vmem>>, vector<1x32xf32>
    %30 = vector.broadcast %29 : vector<1x32xf32> to vector<8x32xf32>
    %31 = arith.addf %28, %30 : vector<8x32xf32>
    %32 = arith.truncf %31 : vector<8x32xf32> to vector<8x32xbf16>
    %c0_16 = arith.constant 0 : index
    %c0_17 = arith.constant 0 : index
    %33 = vector.load %arg21[%c0_16, %c0_17] : memref<8x32xbf16, #tpu.memory_space<vmem>>, vector<8x32xbf16>
    tpu.vector_store %arg21[%c0_16, %c0_17], %32 {strides = array<i32>} : memref<8x32xbf16, #tpu.memory_space<vmem>>, vector<8x32xbf16>,
    %c0_18 = arith.constant 0 : index
    %c0_19 = arith.constant 0 : index
    %34 = vector.load %arg10[%c0_18, %c0_19] : memref<32x32xbf16, #tpu.memory_space<vmem>>, vector<32x32xbf16>
    %cst_20 = arith.constant dense<0.000000e+00> : vector<8x32xf32>
    %35 = tpu.matmul %26, %34, %cst_20 {dimension_numbers = #tpu.dot_dimension_numbers<[1], [0], [0], [1], [0, 0, 1, 1], [], []>} : vector<8x32xbf16>, vector<32x32xbf16>, vector<8x32xf32> -> vector<8x32xf32>
    %c0_21 = arith.constant 0 : index
    %c0_22 = arith.constant 0 : index
    %36 = vector.load %arg11[%c0_21, %c0_22] : memref<1x32xf32, #tpu.memory_space<vmem>>, vector<1x32xf32>
    %37 = vector.broadcast %36 : vector<1x32xf32> to vector<8x32xf32>
    %38 = arith.addf %35, %37 : vector<8x32xf32>
    %39 = arith.truncf %38 : vector<8x32xf32> to vector<8x32xbf16>
    %c0_23 = arith.constant 0 : index
    %c0_24 = arith.constant 0 : index
    %40 = vector.load %arg22[%c0_23, %c0_24] : memref<8x32xbf16, #tpu.memory_space<vmem>>, vector<8x32xbf16>
    tpu.vector_store %arg22[%c0_23, %c0_24], %39 {strides = array<i32>} : memref<8x32xbf16, #tpu.memory_space<vmem>>, vector<8x32xbf16>,
    %c8_i32 = arith.constant 8 : i32
    %41 = arith.muli %arg1, %c8_i32 : i32
    %42 = tpu.assume_multiple %41, 8 : i32
    %c0_25 = arith.constant 0 : index
    %43 = arith.index_cast %42 : i32 to index
    %c0_26 = arith.constant 0 : index
    %44 = vector.load %arg2[%c0_25, %43, %c0_26] : memref<1x8x32xf32, #tpu.memory_space<vmem>>, vector<1x8x32xf32>
    %45 = vector.shape_cast %44 : vector<1x8x32xf32> to vector<8x32xf32>
    %c0_27 = arith.constant 0 : index
    %c0_28 = arith.constant 0 : index
    %c0_29 = arith.constant 0 : index
    %46 = vector.load %arg3[%c0_27, %c0_28, %c0_29] : memref<1x1x8xf32, #tpu.memory_space<vmem>>, vector<1x1x8xf32>
    %47 = vector.shape_cast %46 : vector<1x1x8xf32> to vector<1x8xf32>
    %cst_30 = arith.constant 1.000000e+00 : f32
    %48 = vector.broadcast %cst_30 : f32 to vector<1x8xf32>
    %49 = arith.subf %47, %48 : vector<1x8xf32>
    %cst_31 = arith.constant 1.000000e+09 : f32
    %50 = vector.broadcast %cst_31 : f32 to vector<1x8xf32>
    %51 = arith.mulf %49, %50 : vector<1x8xf32>
    %cst_32 = arith.constant dense<0.000000e+00> : vector<8xf32>
    %52 = vector.multi_reduction <add>, %45, %cst_32 [1] : vector<8x32xf32> to vector<8xf32>
    %53 = vector.shape_cast %52 : vector<8xf32> to vector<8x1xf32>
    %cst_33 = arith.constant 3.125000e-02 : f32
    %54 = vector.broadcast %cst_33 : f32 to vector<8x1xf32>
    %55 = arith.mulf %53, %54 : vector<8x1xf32>
    %56 = vector.broadcast %55 : vector<8x1xf32> to vector<8x32xf32>
    %57 = arith.subf %45, %56 : vector<8x32xf32>
    %58 = arith.mulf %57, %57 : vector<8x32xf32>
    %cst_34 = arith.constant dense<0.000000e+00> : vector<8xf32>
    %59 = vector.multi_reduction <add>, %58, %cst_34 [1] : vector<8x32xf32> to vector<8xf32>
    %60 = vector.shape_cast %59 : vector<8xf32> to vector<8x1xf32>
    %cst_35 = arith.constant 0.0322580636 : f32
    %61 = vector.broadcast %cst_35 : f32 to vector<8x1xf32>
    %62 = arith.mulf %60, %61 : vector<8x1xf32>
    %63 = math.sqrt %62 : vector<8x1xf32>
    %cst_36 = arith.constant 9.99999997E-7 : f32
    %64 = vector.broadcast %cst_36 : f32 to vector<8x1xf32>
    %65 = arith.addf %63, %64 : vector<8x1xf32>
    %cst_37 = arith.constant 1.000000e+00 : f32
    %66 = vector.broadcast %cst_37 : f32 to vector<8x1xf32>
    %67 = arith.divf %66, %65 : vector<8x1xf32>
    %68 = vector.broadcast %67 : vector<8x1xf32> to vector<8x32xf32>
    %69 = arith.mulf %57, %68 : vector<8x32xf32>
    %70 = vector.broadcast %0 : vector<1x32xf32> to vector<8x32xf32>
    %71 = arith.mulf %69, %70 : vector<8x32xf32>
    %72 = vector.broadcast %1 : vector<1x32xf32> to vector<8x32xf32>
    %73 = arith.addf %71, %72 : vector<8x32xf32>
    %74 = arith.truncf %73 : vector<8x32xf32> to vector<8x32xbf16>
    %c0_38 = arith.constant 0 : index
    %c0_39 = arith.constant 0 : index
    %75 = vector.load %arg6[%c0_38, %c0_39] : memref<32x32xbf16, #tpu.memory_space<vmem>>, vector<32x32xbf16>
    %cst_40 = arith.constant dense<0.000000e+00> : vector<8x32xf32>
    %76 = tpu.matmul %74, %75, %cst_40 {dimension_numbers = #tpu.dot_dimension_numbers<[1], [0], [0], [1], [0, 0, 1, 1], [], []>} : vector<8x32xbf16>, vector<32x32xbf16>, vector<8x32xf32> -> vector<8x32xf32>
    %c0_41 = arith.constant 0 : index
    %c0_42 = arith.constant 0 : index
    %77 = vector.load %arg7[%c0_41, %c0_42] : memref<1x32xf32, #tpu.memory_space<vmem>>, vector<1x32xf32>
    %78 = vector.broadcast %77 : vector<1x32xf32> to vector<8x32xf32>
    %79 = arith.addf %76, %78 : vector<8x32xf32>
    %cst_43 = arith.constant 0.353553385 : f32
    %80 = vector.broadcast %cst_43 : f32 to vector<8x32xf32>
    %81 = arith.mulf %79, %80 : vector<8x32xf32>
    %82 = arith.truncf %81 : vector<8x32xf32> to vector<8x32xbf16>
    %c0_44 = arith.constant 0 : index
    %c0_45 = arith.constant 0 : index
    %83 = vector.load %arg21[%c0_44, %c0_45] : memref<8x32xbf16, #tpu.memory_space<vmem>>, vector<8x32xbf16>
    %c0_46 = arith.constant 0 : index
    %c0_47 = arith.constant 0 : index
    %84 = vector.load %arg22[%c0_46, %c0_47] : memref<8x32xbf16, #tpu.memory_space<vmem>>, vector<8x32xbf16>
    %85 = vector.extract_strided_slice %82 {offsets = [0, 0], sizes = [8, 8], strides = [1, 1]} : vector<8x32xbf16> to vector<8x8xbf16>
    %86 = vector.extract_strided_slice %83 {offsets = [0, 0], sizes = [8, 8], strides = [1, 1]} : vector<8x32xbf16> to vector<8x8xbf16>
    %87 = vector.extract_strided_slice %84 {offsets = [0, 0], sizes = [8, 8], strides = [1, 1]} : vector<8x32xbf16> to vector<8x8xbf16>
    %cst_48 = arith.constant dense<0.000000e+00> : vector<8x8xf32>
    %88 = tpu.matmul %85, %86, %cst_48 {dimension_numbers = #tpu.dot_dimension_numbers<[1], [1], [0], [0], [0, 0, 1, 0], [], []>} : vector<8x8xbf16>, vector<8x8xbf16>, vector<8x8xf32> -> vector<8x8xf32>
    %89 = vector.broadcast %51 : vector<1x8xf32> to vector<8x8xf32>
    %90 = arith.addf %88, %89 : vector<8x8xf32>
    %cst_49 = arith.constant dense<0xFF800000> : vector<8xf32>
    %91 = vector.multi_reduction <maximumf>, %90, %cst_49 [1] : vector<8x8xf32> to vector<8xf32>
    %92 = vector.shape_cast %91 : vector<8xf32> to vector<8x1xf32>
    %93 = vector.broadcast %92 : vector<8x1xf32> to vector<8x8xf32>
    %94 = arith.subf %90, %93 : vector<8x8xf32>
    %95 = math.exp %94 : vector<8x8xf32>
    %cst_50 = arith.constant dense<0.000000e+00> : vector<8xf32>
    %96 = vector.multi_reduction <add>, %95, %cst_50 [1] : vector<8x8xf32> to vector<8xf32>
    %97 = vector.shape_cast %96 : vector<8xf32> to vector<8x1xf32>
    %98 = arith.truncf %95 : vector<8x8xf32> to vector<8x8xbf16>
    %cst_51 = arith.constant dense<0.000000e+00> : vector<8x8xf32>
    %99 = tpu.matmul %98, %87, %cst_51 {dimension_numbers = #tpu.dot_dimension_numbers<[1], [0], [0], [1], [0, 0, 1, 1], [], []>} : vector<8x8xbf16>, vector<8x8xbf16>, vector<8x8xf32> -> vector<8x8xf32>
    %100 = tpu.reciprocal %97 : vector<8x1xf32> -> vector<8x1xf32>
    %101 = vector.broadcast %100 : vector<8x1xf32> to vector<8x8xf32>
    %102 = arith.mulf %99, %101 : vector<8x8xf32>
    %103 = arith.truncf %102 : vector<8x8xf32> to vector<8x8xbf16>
    %c0_52 = arith.constant 0 : index
    %c0_53 = arith.constant 0 : index
    %104 = vector.load %arg23[%c0_52, %c0_53] : memref<8x32xbf16, #tpu.memory_space<vmem>>, vector<8x8xbf16>
    tpu.vector_store %arg23[%c0_52, %c0_53], %103 {strides = array<i32>} : memref<8x32xbf16, #tpu.memory_space<vmem>>, vector<8x8xbf16>,
    %105 = vector.extract_strided_slice %82 {offsets = [0, 8], sizes = [8, 8], strides = [1, 1]} : vector<8x32xbf16> to vector<8x8xbf16>
    %106 = vector.extract_strided_slice %83 {offsets = [0, 8], sizes = [8, 8], strides = [1, 1]} : vector<8x32xbf16> to vector<8x8xbf16>
    %107 = vector.extract_strided_slice %84 {offsets = [0, 8], sizes = [8, 8], strides = [1, 1]} : vector<8x32xbf16> to vector<8x8xbf16>
    %cst_54 = arith.constant dense<0.000000e+00> : vector<8x8xf32>
    %108 = tpu.matmul %105, %106, %cst_54 {dimension_numbers = #tpu.dot_dimension_numbers<[1], [1], [0], [0], [0, 0, 1, 0], [], []>} : vector<8x8xbf16>, vector<8x8xbf16>, vector<8x8xf32> -> vector<8x8xf32>
    %109 = vector.broadcast %51 : vector<1x8xf32> to vector<8x8xf32>
    %110 = arith.addf %108, %109 : vector<8x8xf32>
    %cst_55 = arith.constant dense<0xFF800000> : vector<8xf32>
    %111 = vector.multi_reduction <maximumf>, %110, %cst_55 [1] : vector<8x8xf32> to vector<8xf32>
    %112 = vector.shape_cast %111 : vector<8xf32> to vector<8x1xf32>
    %113 = vector.broadcast %112 : vector<8x1xf32> to vector<8x8xf32>
    %114 = arith.subf %110, %113 : vector<8x8xf32>
    %115 = math.exp %114 : vector<8x8xf32>
    %cst_56 = arith.constant dense<0.000000e+00> : vector<8xf32>
    %116 = vector.multi_reduction <add>, %115, %cst_56 [1] : vector<8x8xf32> to vector<8xf32>
    %117 = vector.shape_cast %116 : vector<8xf32> to vector<8x1xf32>
    %118 = arith.truncf %115 : vector<8x8xf32> to vector<8x8xbf16>
    %cst_57 = arith.constant dense<0.000000e+00> : vector<8x8xf32>
    %119 = tpu.matmul %118, %107, %cst_57 {dimension_numbers = #tpu.dot_dimension_numbers<[1], [0], [0], [1], [0, 0, 1, 1], [], []>} : vector<8x8xbf16>, vector<8x8xbf16>, vector<8x8xf32> -> vector<8x8xf32>
    %120 = tpu.reciprocal %117 : vector<8x1xf32> -> vector<8x1xf32>
    %121 = vector.broadcast %120 : vector<8x1xf32> to vector<8x8xf32>
    %122 = arith.mulf %119, %121 : vector<8x8xf32>
    %123 = arith.truncf %122 : vector<8x8xf32> to vector<8x8xbf16>
    %c0_58 = arith.constant 0 : index
    %c8 = arith.constant 8 : index
    %124 = vector.load %arg23[%c0_58, %c8] : memref<8x32xbf16, #tpu.memory_space<vmem>>, vector<8x8xbf16>
    tpu.vector_store %arg23[%c0_58, %c8], %123 {strides = array<i32>} : memref<8x32xbf16, #tpu.memory_space<vmem>>, vector<8x8xbf16>,
    %125 = vector.extract_strided_slice %82 {offsets = [0, 16], sizes = [8, 8], strides = [1, 1]} : vector<8x32xbf16> to vector<8x8xbf16>
    %126 = vector.extract_strided_slice %83 {offsets = [0, 16], sizes = [8, 8], strides = [1, 1]} : vector<8x32xbf16> to vector<8x8xbf16>
    %127 = vector.extract_strided_slice %84 {offsets = [0, 16], sizes = [8, 8], strides = [1, 1]} : vector<8x32xbf16> to vector<8x8xbf16>
    %cst_59 = arith.constant dense<0.000000e+00> : vector<8x8xf32>
    %128 = tpu.matmul %125, %126, %cst_59 {dimension_numbers = #tpu.dot_dimension_numbers<[1], [1], [0], [0], [0, 0, 1, 0], [], []>} : vector<8x8xbf16>, vector<8x8xbf16>, vector<8x8xf32> -> vector<8x8xf32>
    %129 = vector.broadcast %51 : vector<1x8xf32> to vector<8x8xf32>
    %130 = arith.addf %128, %129 : vector<8x8xf32>
    %cst_60 = arith.constant dense<0xFF800000> : vector<8xf32>
    %131 = vector.multi_reduction <maximumf>, %130, %cst_60 [1] : vector<8x8xf32> to vector<8xf32>
    %132 = vector.shape_cast %131 : vector<8xf32> to vector<8x1xf32>
    %133 = vector.broadcast %132 : vector<8x1xf32> to vector<8x8xf32>
    %134 = arith.subf %130, %133 : vector<8x8xf32>
    %135 = math.exp %134 : vector<8x8xf32>
    %cst_61 = arith.constant dense<0.000000e+00> : vector<8xf32>
    %136 = vector.multi_reduction <add>, %135, %cst_61 [1] : vector<8x8xf32> to vector<8xf32>
    %137 = vector.shape_cast %136 : vector<8xf32> to vector<8x1xf32>
    %138 = arith.truncf %135 : vector<8x8xf32> to vector<8x8xbf16>
    %cst_62 = arith.constant dense<0.000000e+00> : vector<8x8xf32>
    %139 = tpu.matmul %138, %127, %cst_62 {dimension_numbers = #tpu.dot_dimension_numbers<[1], [0], [0], [1], [0, 0, 1, 1], [], []>} : vector<8x8xbf16>, vector<8x8xbf16>, vector<8x8xf32> -> vector<8x8xf32>
    %140 = tpu.reciprocal %137 : vector<8x1xf32> -> vector<8x1xf32>
    %141 = vector.broadcast %140 : vector<8x1xf32> to vector<8x8xf32>
    %142 = arith.mulf %139, %141 : vector<8x8xf32>
    %143 = arith.truncf %142 : vector<8x8xf32> to vector<8x8xbf16>
    %c0_63 = arith.constant 0 : index
    %c16 = arith.constant 16 : index
    %144 = vector.load %arg23[%c0_63, %c16] : memref<8x32xbf16, #tpu.memory_space<vmem>>, vector<8x8xbf16>
    tpu.vector_store %arg23[%c0_63, %c16], %143 {strides = array<i32>} : memref<8x32xbf16, #tpu.memory_space<vmem>>, vector<8x8xbf16>,
    %145 = vector.extract_strided_slice %82 {offsets = [0, 24], sizes = [8, 8], strides = [1, 1]} : vector<8x32xbf16> to vector<8x8xbf16>
    %146 = vector.extract_strided_slice %83 {offsets = [0, 24], sizes = [8, 8], strides = [1, 1]} : vector<8x32xbf16> to vector<8x8xbf16>
    %147 = vector.extract_strided_slice %84 {offsets = [0, 24], sizes = [8, 8], strides = [1, 1]} : vector<8x32xbf16> to vector<8x8xbf16>
    %cst_64 = arith.constant dense<0.000000e+00> : vector<8x8xf32>
    %148 = tpu.matmul %145, %146, %cst_64 {dimension_numbers = #tpu.dot_dimension_numbers<[1], [1], [0], [0], [0, 0, 1, 0], [], []>} : vector<8x8xbf16>, vector<8x8xbf16>, vector<8x8xf32> -> vector<8x8xf32>
    %149 = vector.broadcast %51 : vector<1x8xf32> to vector<8x8xf32>
    %150 = arith.addf %148, %149 : vector<8x8xf32>
    %cst_65 = arith.constant dense<0xFF800000> : vector<8xf32>
    %151 = vector.multi_reduction <maximumf>, %150, %cst_65 [1] : vector<8x8xf32> to vector<8xf32>
    %152 = vector.shape_cast %151 : vector<8xf32> to vector<8x1xf32>
    %153 = vector.broadcast %152 : vector<8x1xf32> to vector<8x8xf32>
    %154 = arith.subf %150, %153 : vector<8x8xf32>
    %155 = math.exp %154 : vector<8x8xf32>
    %cst_66 = arith.constant dense<0.000000e+00> : vector<8xf32>
    %156 = vector.multi_reduction <add>, %155, %cst_66 [1] : vector<8x8xf32> to vector<8xf32>
    %157 = vector.shape_cast %156 : vector<8xf32> to vector<8x1xf32>
    %158 = arith.truncf %155 : vector<8x8xf32> to vector<8x8xbf16>
    %cst_67 = arith.constant dense<0.000000e+00> : vector<8x8xf32>
    %159 = tpu.matmul %158, %147, %cst_67 {dimension_numbers = #tpu.dot_dimension_numbers<[1], [0], [0], [1], [0, 0, 1, 1], [], []>} : vector<8x8xbf16>, vector<8x8xbf16>, vector<8x8xf32> -> vector<8x8xf32>
    %160 = tpu.reciprocal %157 : vector<8x1xf32> -> vector<8x1xf32>
    %161 = vector.broadcast %160 : vector<8x1xf32> to vector<8x8xf32>
    %162 = arith.mulf %159, %161 : vector<8x8xf32>
    %163 = arith.truncf %162 : vector<8x8xf32> to vector<8x8xbf16>
    %c0_68 = arith.constant 0 : index
    %c24 = arith.constant 24 : index
    %164 = vector.load %arg23[%c0_68, %c24] : memref<8x32xbf16, #tpu.memory_space<vmem>>, vector<8x8xbf16>
    tpu.vector_store %arg23[%c0_68, %c24], %163 {strides = array<i32>} : memref<8x32xbf16, #tpu.memory_space<vmem>>, vector<8x8xbf16>,
    %c0_69 = arith.constant 0 : index
    %c0_70 = arith.constant 0 : index
    %165 = vector.load %arg23[%c0_69, %c0_70] : memref<8x32xbf16, #tpu.memory_space<vmem>>, vector<8x32xbf16>
    %c0_71 = arith.constant 0 : index
    %c0_72 = arith.constant 0 : index
    %166 = vector.load %arg12[%c0_71, %c0_72] : memref<32x32xbf16, #tpu.memory_space<vmem>>, vector<32x32xbf16>
    %cst_73 = arith.constant dense<0.000000e+00> : vector<8x32xf32>
    %167 = tpu.matmul %165, %166, %cst_73 {dimension_numbers = #tpu.dot_dimension_numbers<[1], [0], [0], [1], [0, 0, 1, 1], [], []>} : vector<8x32xbf16>, vector<32x32xbf16>, vector<8x32xf32> -> vector<8x32xf32>
    %c0_74 = arith.constant 0 : index
    %c0_75 = arith.constant 0 : index
    %168 = vector.load %arg13[%c0_74, %c0_75] : memref<1x32xf32, #tpu.memory_space<vmem>>, vector<1x32xf32>
    %169 = vector.broadcast %168 : vector<1x32xf32> to vector<8x32xf32>
    %170 = arith.addf %167, %169 : vector<8x32xf32>
    %171 = arith.addf %45, %170 : vector<8x32xf32>
    %c0_76 = arith.constant 0 : index
    %c0_77 = arith.constant 0 : index
    %172 = vector.load %arg14[%c0_76, %c0_77] : memref<1x32xf32, #tpu.memory_space<vmem>>, vector<1x32xf32>
    %c0_78 = arith.constant 0 : index
    %c0_79 = arith.constant 0 : index
    %173 = vector.load %arg15[%c0_78, %c0_79] : memref<1x32xf32, #tpu.memory_space<vmem>>, vector<1x32xf32>
    %cst_80 = arith.constant dense<0.000000e+00> : vector<8xf32>
    %174 = vector.multi_reduction <add>, %171, %cst_80 [1] : vector<8x32xf32> to vector<8xf32>
    %175 = vector.shape_cast %174 : vector<8xf32> to vector<8x1xf32>
    %cst_81 = arith.constant 3.125000e-02 : f32
    %176 = vector.broadcast %cst_81 : f32 to vector<8x1xf32>
    %177 = arith.mulf %175, %176 : vector<8x1xf32>
    %178 = vector.broadcast %177 : vector<8x1xf32> to vector<8x32xf32>
    %179 = arith.subf %171, %178 : vector<8x32xf32>
    %180 = arith.mulf %179, %179 : vector<8x32xf32>
    %cst_82 = arith.constant dense<0.000000e+00> : vector<8xf32>
    %181 = vector.multi_reduction <add>, %180, %cst_82 [1] : vector<8x32xf32> to vector<8xf32>
    %182 = vector.shape_cast %181 : vector<8xf32> to vector<8x1xf32>
    %cst_83 = arith.constant 0.0322580636 : f32
    %183 = vector.broadcast %cst_83 : f32 to vector<8x1xf32>
    %184 = arith.mulf %182, %183 : vector<8x1xf32>
    %185 = math.sqrt %184 : vector<8x1xf32>
    %cst_84 = arith.constant 9.99999997E-7 : f32
    %186 = vector.broadcast %cst_84 : f32 to vector<8x1xf32>
    %187 = arith.addf %185, %186 : vector<8x1xf32>
    %cst_85 = arith.constant 1.000000e+00 : f32
    %188 = vector.broadcast %cst_85 : f32 to vector<8x1xf32>
    %189 = arith.divf %188, %187 : vector<8x1xf32>
    %190 = vector.broadcast %189 : vector<8x1xf32> to vector<8x32xf32>
    %191 = arith.mulf %179, %190 : vector<8x32xf32>
    %192 = vector.broadcast %172 : vector<1x32xf32> to vector<8x32xf32>
    %193 = arith.mulf %191, %192 : vector<8x32xf32>
    %194 = vector.broadcast %173 : vector<1x32xf32> to vector<8x32xf32>
    %195 = arith.addf %193, %194 : vector<8x32xf32>
    %196 = arith.truncf %195 : vector<8x32xf32> to vector<8x32xbf16>
    %c0_86 = arith.constant 0 : index
    %c0_87 = arith.constant 0 : index
    %197 = vector.load %arg16[%c0_86, %c0_87] : memref<32x64xbf16, #tpu.memory_space<vmem>>, vector<32x64xbf16>
    %cst_88 = arith.constant dense<0.000000e+00> : vector<8x64xf32>
    %198 = tpu.matmul %196, %197, %cst_88 {dimension_numbers = #tpu.dot_dimension_numbers<[1], [0], [0], [1], [0, 0, 1, 1], [], []>} : vector<8x32xbf16>, vector<32x64xbf16>, vector<8x64xf32> -> vector<8x64xf32>
    %c0_89 = arith.constant 0 : index
    %c0_90 = arith.constant 0 : index
    %199 = vector.load %arg17[%c0_89, %c0_90] : memref<1x64xf32, #tpu.memory_space<vmem>>, vector<1x64xf32>
    %200 = vector.broadcast %199 : vector<1x64xf32> to vector<8x64xf32>
    %201 = arith.addf %198, %200 : vector<8x64xf32>
    %cst_91 = arith.constant 0.000000e+00 : f32
    %202 = vector.broadcast %cst_91 : f32 to vector<8x64xf32>
    %203 = arith.maximumf %201, %202 : vector<8x64xf32>
    %204 = arith.truncf %203 : vector<8x64xf32> to vector<8x64xbf16>
    %c0_92 = arith.constant 0 : index
    %c0_93 = arith.constant 0 : index
    %205 = vector.load %arg18[%c0_92, %c0_93] : memref<64x32xbf16, #tpu.memory_space<vmem>>, vector<64x32xbf16>
    %cst_94 = arith.constant dense<0.000000e+00> : vector<8x32xf32>
    %206 = tpu.matmul %204, %205, %cst_94 {dimension_numbers = #tpu.dot_dimension_numbers<[1], [0], [0], [1], [0, 0, 1, 1], [], []>} : vector<8x64xbf16>, vector<64x32xbf16>, vector<8x32xf32> -> vector<8x32xf32>
    %c0_95 = arith.constant 0 : index
    %c0_96 = arith.constant 0 : index
    %207 = vector.load %arg19[%c0_95, %c0_96] : memref<1x32xf32, #tpu.memory_space<vmem>>, vector<1x32xf32>
    %208 = vector.broadcast %207 : vector<1x32xf32> to vector<8x32xf32>
    %209 = arith.addf %206, %208 : vector<8x32xf32>
    %210 = arith.addf %171, %209 : vector<8x32xf32>
    %c0_97 = arith.constant 0 : index
    %c0_98 = arith.constant 0 : index
    %c0_99 = arith.constant 0 : index
    %211 = vector.load %arg20[%c0_97, %c0_98, %c0_99] : memref<1x8x32xf32, #tpu.memory_space<vmem>>, vector<1x8x32xf32>
    %212 = vector.shape_cast %211 : vector<1x8x32xf32> to vector<8x32xf32>
    %213 = vector.shape_cast %210 : vector<8x32xf32> to vector<1x8x32xf32>
    tpu.vector_store %arg20[%c0_97, %c0_98, %c0_99], %213 {strides = array<i32>} : memref<1x8x32xf32, #tpu.memory_space<vmem>>, vector<1x8x32xf32>,
    return
  }
  func.func @transform_0(%arg0: i32, %arg1: i32) -> (i32, i32, i32) {
    %c0_i32 = arith.constant 0 : i32
    %c0_i32_0 = arith.constant 0 : i32
    %c0_i32_1 = arith.constant 0 : i32
    return %arg0, %c0_i32, %c0_i32_0 : i32, i32, i32
  }
  func.func @transform_1(%arg0: i32, %arg1: i32) -> (i32, i32, i32) {
    %c0_i32 = arith.constant 0 : i32
    %c0_i32_0 = arith.constant 0 : i32
    %c0_i32_1 = arith.constant 0 : i32
    return %arg0, %c0_i32, %c0_i32_0 : i32, i32, i32
  }
  func.func @transform_2(%arg0: i32, %arg1: i32) -> (i32, i32) {
    %c0_i32 = arith.constant 0 : i32
    %c0_i32_0 = arith.constant 0 : i32
    %c0_i32_1 = arith.constant 0 : i32
    return %c0_i32, %c0_i32_0 : i32, i32
  }
  func.func @transform_3(%arg0: i32, %arg1: i32) -> (i32, i32) {
    %c0_i32 = arith.constant 0 : i32
    %c0_i32_0 = arith.constant 0 : i32
    %c0_i32_1 = arith.constant 0 : i32
    return %c0_i32, %c0_i32_0 : i32, i32
  }
  func.func @transform_4(%arg0: i32, %arg1: i32) -> (i32, i32) {
    %c0_i32 = arith.constant 0 : i32
    %c0_i32_0 = arith.constant 0 : i32
    %c0_i32_1 = arith.constant 0 : i32
    return %c0_i32, %c0_i32_0 : i32, i32
  }
  func.func @transform_5(%arg0: i32, %arg1: i32) -> (i32, i32) {
    %c0_i32 = arith.constant 0 : i32
    %c0_i32_0 = arith.constant 0 : i32
    %c0_i32_1 = arith.constant 0 : i32
    return %c0_i32, %c0_i32_0 : i32, i32
  }
  func.func @transform_6(%arg0: i32, %arg1: i32) -> (i32, i32) {
    %c0_i32 = arith.constant 0 : i32
    %c0_i32_0 = arith.constant 0 : i32
    %c0_i32_1 = arith.constant 0 : i32
    return %c0_i32, %c0_i32_0 : i32, i32
  }
  func.func @transform_7(%arg0: i32, %arg1: i32) -> (i32, i32) {
    %c0_i32 = arith.constant 0 : i32
    %c0_i32_0 = arith.constant 0 : i32
    %c0_i32_1 = arith.constant 0 : i32
    return %c0_i32, %c0_i32_0 : i32, i32
  }
  func.func @transform_8(%arg0: i32, %arg1: i32) -> (i32, i32) {
    %c0_i32 = arith.constant 0 : i32
    %c0_i32_0 = arith.constant 0 : i32
    %c0_i32_1 = arith.constant 0 : i32
    return %c0_i32, %c0_i32_0 : i32, i32
  }
  func.func @transform_9(%arg0: i32, %arg1: i32) -> (i32, i32) {
    %c0_i32 = arith.constant 0 : i32
    %c0_i32_0 = arith.constant 0 : i32
    %c0_i32_1 = arith.constant 0 : i32
    return %c0_i32, %c0_i32_0 : i32, i32
  }
  func.func @transform_10(%arg0: i32, %arg1: i32) -> (i32, i32) {
    %c0_i32 = arith.constant 0 : i32
    %c0_i32_0 = arith.constant 0 : i32
    %c0_i32_1 = arith.constant 0 : i32
    return %c0_i32, %c0_i32_0 : i32, i32
  }
  func.func @transform_11(%arg0: i32, %arg1: i32) -> (i32, i32) {
    %c0_i32 = arith.constant 0 : i32
    %c0_i32_0 = arith.constant 0 : i32
    %c0_i32_1 = arith.constant 0 : i32
    return %c0_i32, %c0_i32_0 : i32, i32
  }
  func.func @transform_12(%arg0: i32, %arg1: i32) -> (i32, i32) {
    %c0_i32 = arith.constant 0 : i32
    %c0_i32_0 = arith.constant 0 : i32
    %c0_i32_1 = arith.constant 0 : i32
    return %c0_i32, %c0_i32_0 : i32, i32
  }
  func.func @transform_13(%arg0: i32, %arg1: i32) -> (i32, i32) {
    %c0_i32 = arith.constant 0 : i32
    %c0_i32_0 = arith.constant 0 : i32
    %c0_i32_1 = arith.constant 0 : i32
    return %c0_i32, %c0_i32_0 : i32, i32
  }
  func.func @transform_14(%arg0: i32, %arg1: i32) -> (i32, i32) {
    %c0_i32 = arith.constant 0 : i32
    %c0_i32_0 = arith.constant 0 : i32
    %c0_i32_1 = arith.constant 0 : i32
    return %c0_i32, %c0_i32_0 : i32, i32
  }
  func.func @transform_15(%arg0: i32, %arg1: i32) -> (i32, i32) {
    %c0_i32 = arith.constant 0 : i32
    %c0_i32_0 = arith.constant 0 : i32
    %c0_i32_1 = arith.constant 0 : i32
    return %c0_i32, %c0_i32_0 : i32, i32
  }
  func.func @transform_16(%arg0: i32, %arg1: i32) -> (i32, i32) {
    %c0_i32 = arith.constant 0 : i32
    %c0_i32_0 = arith.constant 0 : i32
    %c0_i32_1 = arith.constant 0 : i32
    return %c0_i32, %c0_i32_0 : i32, i32
  }
  func.func @transform_17(%arg0: i32, %arg1: i32) -> (i32, i32) {
    %c0_i32 = arith.constant 0 : i32
    %c0_i32_0 = arith.constant 0 : i32
    %c0_i32_1 = arith.constant 0 : i32
    return %c0_i32, %c0_i32_0 : i32, i32
  }
  func.func @transform_18(%arg0: i32, %arg1: i32) -> (i32, i32, i32) {
    %c0_i32 = arith.constant 0 : i32
    %c0_i32_0 = arith.constant 0 : i32
    return %arg0, %arg1, %c0_i32 : i32, i32, i32
  }
}

</mosaic_0001>

<bundles_post_ra>
// kernel: tpu_custom_call.1
= control target key start
LH: loop header
LB: loop body
LE: loop exit
PB: predicated region body
PF: predicated region fallthrough
CT: control target
= control target key end

     0   :  { %s3337_s0 = inlined_call_operand.vmem [shape: f32[2,8,32], index: 0, kind: input, shape index: {}]   ;;  %s3338_s1 = inlined_call_operand.hbm [shape: f32[2,1,8], index: 1, kind: input, shape index: {}]   ;;  %s3339_s2 = inlined_call_operand.vmem [shape: f32[1,32], index: 2, kind: input, shape index: {}]   ;;  %s3340_s3 = inlined_call_operand.hbm [shape: f32[1,32], index: 3, kind: input, shape index: {}]   ;;  %s3341_s4 = inlined_call_operand.vmem [shape: bf16[32,32], index: 4, kind: input, shape index: {}]   ;;  %s3342_s5 = inlined_call_operand.hbm [shape: f32[1,32], index: 5, kind: input, shape index: {}]   ;;  %s3343_s6 = inlined_call_operand.vmem [shape: bf16[32,32], index: 6, kind: input, shape index: {}]   ;;  %s3344_s7 = inlined_call_operand.hbm [shape: f32[1,32], index: 7, kind: input, shape index: {}]   ;;  %s3345_s8 = inlined_call_operand.hbm [shape: bf16[32,32], index: 8, kind: input, shape index: {}]   ;;  %s3346_s9 = inlined_call_operand.hbm [shape: f32[1,32], index: 9, kind: input, shape index: {}]   ;;  %s3347_s10 = inlined_call_operand.vmem [shape: bf16[32,32], index: 10, kind: input, shape index: {}]   ;;  %s3348_s11 = inlined_call_operand.hbm [shape: f32[1,32], index: 11, kind: input, shape index: {}]   ;;  %s3349_s12 = inlined_call_operand.hbm [shape: f32[1,32], index: 12, kind: input, shape index: {}]   ;;  %s3350_s13 = inlined_call_operand.hbm [shape: f32[1,32], index: 13, kind: input, shape index: {}]   ;;  %s3351_s14 = inlined_call_operand.vmem [shape: bf16[32,64], index: 14, kind: input, shape index: {}]   ;;  %s3352_s15 = inlined_call_operand.vmem [shape: f32[1,64], index: 15, kind: input, shape index: {}]   ;;  %s3353_s16 = inlined_call_operand.vmem [shape: bf16[64,32], index: 16, kind: input, shape index: {}]   ;;  %s3354_s17 = inlined_call_operand.vmem [shape: f32[1,32], index: 17, kind: input, shape index: {}]   ;;  %s3355_s18 = inlined_call_operand.hbm [shape: f32[2,8,32], index: 18, kind: output, shape index: {}]  }
   0x1   :  { %3368 = sst [smem:[#allocation27_spill]] %s3337_s0 }
   0x2   :  { %3369 = sst [smem:[#allocation28_spill]] %s3338_s1 }
   0x3   :  { %3370 = sst [smem:[#allocation29_spill]] %s3339_s2 }
   0x4   :  { %3371 = sst [smem:[#allocation30_spill]] %s3340_s3 }
   0x5   :  { %3372 = sst [smem:[#allocation31_spill]] %s3341_s4 }
   0x6   :  { %3373 = sst [smem:[#allocation32_spill]] %s3342_s5 }
   0x7   :  { %3374 = sst [smem:[#allocation33_spill]] %s3343_s6 }
   0x8   :  { %3375 = sst [smem:[#allocation34_spill]] %s3344_s7 }
   0x9   :  { %3376 = sst [smem:[#allocation35_spill]] %s3347_s10 }
   0xa   :  { %3377 = sst [smem:[#allocation36_spill]] %s3351_s14 }
   0xb   :  { %3378 = sst [smem:[#allocation37_spill]] %s3352_s15 }
   0xc   :  { %3379 = sst [smem:[#allocation38_spill]] %s3353_s16 }
   0xd   :  { %3380 = sst [smem:[#allocation39_spill]] %s3354_s17 }
   0xe   :  { %3381 = sst [smem:[#allocation40_spill]] %s3355_s18 }
   0xf   :  { %23 = vsyncpa [#allocation6], 0 }
  0x10   :  { %25 = vsyncpa [#allocation6 + $0x1], 0 }
  0x11   :  { %26 = vsyncpa [#allocation9], 0 }
  0x12   :  { %27 = vsyncpa [#allocation12], 0 }
  0x13   :  { %28 = vsyncpa [#allocation15], 0 }
  0x14   :  { %29 = vsyncpa [#allocation18], 0 }
  0x15   :  { %30 = vsyncpa [#allocation7], 0 }
  0x16   :  { %32 = vsyncpa [#allocation7 + $0x1], 0  ;;  %s2792_s27 = smov 0   ;;  %s2794_s28 = smov 0  }
  0x17   :  { %s2796_s29 = smov 0   ;;  %s2798_s30 = smov 0  }
  0x18   :  { %s2800_s0 = smov 0   ;;  %s2802_s19 = smov 0  }
  0x19 LB: > { %s3357_s1 = sadd.s32 4294967295, %s2675_s19   ;;  %p1917_p0 = scmp.ge.s32.totalorder %s2675_s19, 1  ;;  %s2675_s19 = sphi %s2802_s19, %s38_s19   ;;  %s2671_s0 = sphi %s2800_s0, %s3416_s0   ;;  %s2667_s30 = sphi %s2798_s30, %s3415_s30   ;;  %s2663_s29 = sphi %s2796_s29, %s3414_s29   ;;  %s2659_s28 = sphi %s2794_s28, %s3413_s28   ;;  %s2655_s27 = sphi %s2792_s27, %s3412_s27  }
  0x1a   : > { %p2826_p1 = scmp.eq.s32.totalorder %s3357_s1, 0  ;;  %p471_p2 = scmp.lt.s32.totalorder %s2675_s19, 3 }
  0x1b   : > { %s2677_s22 = smov [#allocation8]   ;;  %s2678_s23 = smov [#allocation11]  }
  0x1c   : > { %s3382_s20 = scalar_select %p2826_p1, 1, 0 }
  0x1d   : > { %p2831_p3 = pnand %p1917_p0, %p471_p2  ;;  %s487_s2 = sshll.u32 %s2677_s22, 4  ;;  %s488_s2 = int_to_ptr.vmem [resolvable:$true] %s487_s2 }
  0x1e   : > { %s515_s24 = sshll.u32 %s2678_s23, 4  ;;  %s2679_s26 = smov [#allocation14]   ;;  %s2844_s24 = int_to_ptr.vmem [resolvable:$true] %s515_s24 }
  0x1f   : > { %s3383_s21 = scalar_select %p2831_p3, 1, 0 }
  0x20   : > { %p2162_p5 = pneg %p2831_p3  ;;  %s539_s1 = sshll.u32 %s2679_s26, 4  ;;  %s2846_s1 = int_to_ptr.vmem [resolvable:$true] %s539_s1 }
  0x21   : > { %s3385_s3 = sld [smem:[#allocation30_spill]] }
  0x22   : > { %p2840_p6 = pnand %p2162_p5, %p2826_p1 }
  0x24   : > { %p2856_p8 = pneg %p2840_p6 }
  0x27   : > { %s2323_s17 = scalar_lea.hbm %s3385_s3, 16 }
  0x28   : > { %p2324_p7 = scmp.ne.s32.totalorder %s3385_s3, %s2323_s17  ;;  %p2330_p11 = scmp.lt.u32.totalorder %s2323_s17, %s3385_s3 }
  0x2a   : > { %p2326_p9 = pnand %p2856_p8, %p2324_p7 }
  0x2c   : > { %p2327_p10 = pneg %p2326_p9 }
  0x2e   : > { %p2332_p12 = pnand %p2330_p11, %p2327_p10 }
  0x30   : > { %2335 = shalt.err (!%p2332_p12)
}
  0x31   : > { %s2336_s18 = scalar_lea.vmem %s488_s2, 16  ;;  %s2343_s15 = scalar_lea.vmem %s488_s2, 32 }
  0x32   : > { %p2337_p13 = scmp.ne.s32.totalorder %s488_s2, %s2336_s18  ;;  %p2344_p5 = scmp.lt.s32.totalorder %s488_s2, %s488_s2 }
  0x33   : > { %p2345_p4 = scmp.lt.s32.totalorder %s2343_s15, %s2336_s18 }
  0x34   : > { %p2339_p0 = pnand %p2337_p13, %p2856_p8 }
  0x35   : > { %p2346_p3 = por %p2345_p4, %p2344_p5 }
  0x36   : > { %p2340_p2 = pneg %p2339_p0 }
  0x38   : > { %p2347_p1 = pnand %p2346_p3, %p2340_p2 }
  0x3a   : > { %2350 = shalt.err (!%p2347_p1)
}
  0x3b   : > { %2165 = dma.hbm_to_vmem [thread:$0]  (!%p2840_p6), %s3385_s3, 16, %s488_s2, [#allocation9]  }
  0x3c   : > { %s3387_s7 = sld [smem:[#allocation34_spill]] }
  0x42   : > { %s2351_s26 = scalar_lea.hbm %s3387_s7, 16 }
  0x43   : > { %p2352_p7 = scmp.ne.s32.totalorder %s3387_s7, %s2351_s26  ;;  %p2358_p1 = scmp.lt.u32.totalorder %s2351_s26, %s3387_s7 }
  0x45   : > { %p2354_p9 = pnand %p2352_p7, %p2856_p8 }
  0x47   : > { %p2355_p4 = pneg %p2354_p9 }
  0x49   : > { %p2360_p3 = pnand %p2358_p1, %p2355_p4 }
  0x4b   : > { %2363 = shalt.err (!%p2360_p3)
}
  0x4c   : > { %s2364_s2 = scalar_lea.vmem %s2844_s24, 16  ;;  %s2371_s4 = scalar_lea.vmem %s2844_s24, 32 }
  0x4d   : > { %p2365_p10 = scmp.ne.s32.totalorder %s2844_s24, %s2364_s2  ;;  %p2372_p13 = scmp.lt.s32.totalorder %s2844_s24, %s2844_s24 }
  0x4e   : > { %p2373_p0 = scmp.lt.s32.totalorder %s2371_s4, %s2364_s2 }
  0x4f   : > { %p2367_p11 = pnand %p2365_p10, %p2856_p8 }
  0x50   : > { %p2374_p2 = por %p2373_p0, %p2372_p13 }
  0x51   : > { %p2368_p12 = pneg %p2367_p11 }
  0x53   : > { %p2375_p5 = pnand %p2374_p2, %p2368_p12 }
  0x55   : > { %2378 = shalt.err (!%p2375_p5)
}
  0x56   : > { %2171 = dma.hbm_to_vmem [thread:$0]  (!%p2840_p6), %s3387_s7, 16, %s2844_s24, [#allocation12]  }
  0x57   : > { %s2379_s17 = scalar_lea.hbm %s3346_s9, 16 }
  0x58   : > { %p2380_p7 = scmp.ne.s32.totalorder %s3346_s9, %s2379_s17  ;;  %p2386_p1 = scmp.lt.u32.totalorder %s2379_s17, %s3346_s9 }
  0x5a   : > { %p2382_p9 = pnand %p2380_p7, %p2856_p8 }
  0x5c   : > { %p2383_p4 = pneg %p2382_p9 }
  0x5e   : > { %p2388_p3 = pnand %p2386_p1, %p2383_p4 }
  0x60   : > { %2391 = shalt.err (!%p2388_p3)
}
  0x61   : > { %s2392_s24 = scalar_lea.vmem %s2846_s1, 16  ;;  %s2399_s4 = scalar_lea.vmem %s2846_s1, 32 }
  0x62   : > { %p2393_p10 = scmp.ne.s32.totalorder %s2846_s1, %s2392_s24  ;;  %p2400_p13 = scmp.lt.s32.totalorder %s2846_s1, %s2846_s1 }
  0x63   : > { %p2401_p0 = scmp.lt.s32.totalorder %s2399_s4, %s2392_s24 }
  0x64   : > { %p2395_p11 = pnand %p2393_p10, %p2856_p8 }
  0x65   : > { %p2402_p2 = por %p2401_p0, %p2400_p13 }
  0x66   : > { %p2396_p12 = pneg %p2395_p11 }
  0x68   : > { %p2403_p5 = pnand %p2402_p2, %p2396_p12 }
  0x6a   : > { %2406 = shalt.err (!%p2403_p5)
}
  0x6b   : > { %2177 = dma.hbm_to_vmem [thread:$0]  (!%p2840_p6), %s3346_s9, 16, %s2846_s1, [#allocation15]  }
  0x6c   : > { %s2680_s22 = smov [#allocation17]   ;;  %s2681_s17 = smov [#allocation10]  }
  0x6d   : > { %s564_s14 = sshll.u32 %s2680_s22, 4  ;;  %s501_s26 = sshll.u32 %s2681_s17, 4  ;;  %s565_s14 = int_to_ptr.vmem [resolvable:$true] %s564_s14  ;;  %s502_s26 = int_to_ptr.vmem [resolvable:$true] %s501_s26 }
  0x6e   : > { %s2407_s2 = scalar_lea.hbm %s3349_s12, 16 }
  0x6f   : > { %p2408_p7 = scmp.ne.s32.totalorder %s3349_s12, %s2407_s2  ;;  %p2414_p1 = scmp.lt.u32.totalorder %s2407_s2, %s3349_s12 }
  0x71   : > { %p2410_p9 = pnand %p2408_p7, %p2856_p8 }
  0x73   : > { %p2411_p4 = pneg %p2410_p9 }
  0x75   : > { %p2416_p3 = pnand %p2414_p1, %p2411_p4 }
  0x77   : > { %2419 = shalt.err (!%p2416_p3)
}
  0x78   : > { %s2420_s1 = scalar_lea.vmem %s565_s14, 16  ;;  %s2427_s16 = scalar_lea.vmem %s565_s14, 32 }
  0x79   : > { %p2421_p10 = scmp.ne.s32.totalorder %s565_s14, %s2420_s1  ;;  %p2428_p13 = scmp.lt.s32.totalorder %s565_s14, %s565_s14 }
  0x7a   : > { %p2429_p0 = scmp.lt.s32.totalorder %s2427_s16, %s2420_s1 }
  0x7b   : > { %p2423_p11 = pnand %p2421_p10, %p2856_p8 }
  0x7c   : > { %p2430_p2 = por %p2429_p0, %p2428_p13 }
  0x7d   : > { %p2424_p12 = pneg %p2423_p11 }
  0x7f   : > { %p2431_p5 = pnand %p2430_p2, %p2424_p12 }
  0x81   : > { %2434 = shalt.err (!%p2431_p5)
}
  0x82   : > { %2183 = dma.hbm_to_vmem [thread:$0]  (!%p2840_p6), %s3349_s12, 16, %s565_s14, [#allocation18]  }
  0x83   : > { %s3388_s5 = sld [smem:[#allocation32_spill]] }
  0x89   : > { %s2435_s15 = scalar_lea.hbm %s3388_s5, 16 }
  0x8a   : > { %p2436_p7 = scmp.ne.s32.totalorder %s3388_s5, %s2435_s15  ;;  %p2442_p1 = scmp.lt.u32.totalorder %s2435_s15, %s3388_s5 }
  0x8c   : > { %p2438_p9 = pnand %p2436_p7, %p2856_p8 }
  0x8e   : > { %p2439_p4 = pneg %p2438_p9 }
  0x90   : > { %p2444_p3 = pnand %p2442_p1, %p2439_p4 }
  0x92   : > { %2447 = shalt.err (!%p2444_p3)
}
  0x93   : > { %s2448_s1 = scalar_lea.vmem %s502_s26, 16  ;;  %s2455_s14 = scalar_lea.vmem %s502_s26, 32 }
  0x94   : > { %p2449_p10 = scmp.ne.s32.totalorder %s502_s26, %s2448_s1  ;;  %p2456_p13 = scmp.lt.s32.totalorder %s502_s26, %s502_s26 }
  0x95   : > { %p2457_p0 = scmp.lt.s32.totalorder %s2455_s14, %s2448_s1 }
  0x96   : > { %p2451_p11 = pnand %p2449_p10, %p2856_p8 }
  0x97   : > { %p2458_p2 = por %p2457_p0, %p2456_p13 }
  0x98   : > { %p2452_p12 = pneg %p2451_p11 }
  0x9a   : > { %p2459_p5 = pnand %p2458_p2, %p2452_p12 }
  0x9c   : > { %2462 = shalt.err (!%p2459_p5)
}
  0x9d   : > { %2168 = dma.hbm_to_vmem [thread:$0]  (!%p2840_p6), %s3388_s5, 16, %s502_s26, [#allocation9]  }
  0x9e   : > { %s2682_s17 = smov [#allocation13]   ;;  %s2463_s2 = scalar_lea.hbm %s3345_s8, 256 }
  0x9f   : > { %s525_s3 = sshll.u32 %s2682_s17, 4  ;;  %p2464_p7 = scmp.ne.s32.totalorder %s3345_s8, %s2463_s2  ;;  %s526_s3 = int_to_ptr.vmem [resolvable:$true] %s525_s3 }
  0xa0   : > { %p2470_p1 = scmp.lt.u32.totalorder %s2463_s2, %s3345_s8 }
  0xa1   : > { %p2466_p9 = pnand %p2464_p7, %p2856_p8 }
  0xa3   : > { %p2467_p4 = pneg %p2466_p9 }
  0xa5   : > { %p2472_p3 = pnand %p2470_p1, %p2467_p4 }
  0xa7   : > { %2475 = shalt.err (!%p2472_p3)
}
  0xa8   : > { %s2476_s26 = scalar_lea.vmem %s526_s3, 256  ;;  %p2484_p13 = scmp.lt.s32.totalorder %s526_s3, %s526_s3 }
  0xa9   : > { %p2477_p10 = scmp.ne.s32.totalorder %s526_s3, %s2476_s26  ;;  %p2485_p0 = scmp.lt.s32.totalorder %s2476_s26, %s2476_s26 }
  0xab   : > { %p2479_p11 = pnand %p2477_p10, %p2856_p8  ;;  %p2486_p2 = por %p2485_p0, %p2484_p13 }
  0xad   : > { %p2480_p12 = pneg %p2479_p11 }
  0xaf   : > { %p2487_p5 = pnand %p2486_p2, %p2480_p12 }
  0xb1   : > { %2490 = shalt.err (!%p2487_p5)
}
  0xb2   : > { %s2683_s14 = smov 64   ;;  %s2684_s16 = smov 4  }
  0xb3   : > { %2174 = dma.hbm_to_vmem [thread:$0]  (!%p2840_p6), %s3345_s8, 256, %s526_s3, [#allocation12], %s2683_s14, %s2683_s14, %s2684_s16  }
  0xb4   : > { %s2685_s18 = smov [#allocation16]   ;;  %s2686_s2 = smov [#allocation19]  }
  0xb5   : > { %s553_s15 = sshll.u32 %s2685_s18, 4  ;;  %s575_s24 = sshll.u32 %s2686_s2, 4  ;;  %s554_s15 = int_to_ptr.vmem [resolvable:$true] %s553_s15  ;;  %s2974_s24 = int_to_ptr.vmem [resolvable:$true] %s575_s24 }
  0xb6   : > { %s2491_s1 = scalar_lea.hbm %s3348_s11, 16 }
  0xb7   : > { %p2492_p7 = scmp.ne.s32.totalorder %s3348_s11, %s2491_s1  ;;  %p2498_p1 = scmp.lt.u32.totalorder %s2491_s1, %s3348_s11 }
  0xb9   : > { %p2494_p9 = pnand %p2492_p7, %p2856_p8 }
  0xbb   : > { %p2495_p4 = pneg %p2494_p9 }
  0xbd   : > { %p2500_p3 = pnand %p2498_p1, %p2495_p4 }
  0xbf   : > { %2503 = shalt.err (!%p2500_p3)
}
  0xc0   : > { %s2504_s14 = scalar_lea.vmem %s554_s15, 16  ;;  %s2511_s16 = scalar_lea.vmem %s554_s15, 32 }
  0xc1   : > { %p2505_p10 = scmp.ne.s32.totalorder %s554_s15, %s2504_s14  ;;  %p2512_p13 = scmp.lt.s32.totalorder %s554_s15, %s554_s15 }
  0xc2   : > { %p2513_p0 = scmp.lt.s32.totalorder %s2511_s16, %s2504_s14 }
  0xc3   : > { %p2507_p11 = pnand %p2505_p10, %p2856_p8 }
  0xc4   : > { %p2514_p2 = por %p2513_p0, %p2512_p13 }
  0xc5   : > { %p2508_p12 = pneg %p2507_p11 }
  0xc7   : > { %p2515_p5 = pnand %p2514_p2, %p2508_p12 }
  0xc9   : > { %2518 = shalt.err (!%p2515_p5)
}
  0xca   : > { %2180 = dma.hbm_to_vmem [thread:$0]  (!%p2840_p6), %s3348_s11, 16, %s554_s15, [#allocation15]  }
  0xcb   : > { %s2519_s4 = scalar_lea.hbm %s3350_s13, 16 }
  0xcc   : > { %p2520_p7 = scmp.ne.s32.totalorder %s3350_s13, %s2519_s4  ;;  %p2526_p1 = scmp.lt.u32.totalorder %s2519_s4, %s3350_s13 }
  0xce   : > { %p2522_p9 = pnand %p2520_p7, %p2856_p8 }
  0xd0   : > { %p2523_p4 = pneg %p2522_p9 }
  0xd2   : > { %p2528_p3 = pnand %p2526_p1, %p2523_p4 }
  0xd4   : > { %2531 = shalt.err (!%p2528_p3)
}
  0xd5   : > { %s2532_s15 = scalar_lea.vmem %s2974_s24, 16  ;;  %s2539_s3 = scalar_lea.vmem %s2974_s24, 32 }
  0xd6   : > { %p2533_p10 = scmp.ne.s32.totalorder %s2974_s24, %s2532_s15  ;;  %p2540_p13 = scmp.lt.s32.totalorder %s2974_s24, %s2974_s24 }
  0xd7   : > { %p2541_p0 = scmp.lt.s32.totalorder %s2539_s3, %s2532_s15 }
  0xd8   : > { %p2535_p11 = pnand %p2533_p10, %p2856_p8 }
  0xd9   : > { %p2542_p2 = por %p2541_p0, %p2540_p13 }
  0xda   : > { %p2536_p12 = pneg %p2535_p11 }
  0xdc   : > { %p2543_p5 = pnand %p2542_p2, %p2536_p12 }
  0xde   : > { %2546 = shalt.err (!%p2543_p5)
}
  0xdf   : > { %2186 = dma.hbm_to_vmem [thread:$0]  (!%p2840_p6), %s3350_s13, 16, %s2974_s24, [#allocation18]  }
  0xe0   : > { %s1916_s23 = sadd.s32 4294967294, %s2675_s19   ;;  %s50_s5 = sadd.s32 1, %s2671_s0 }
  0xe1   : > { %p52_p8 = scmp.ge.s32.totalorder %s50_s5, 2  ;;  %s83_s25 = sadd.s32 1, %s2663_s29 }
  0xe2   : > { %p90_p7 = scmp.ne.s32.totalorder %s2663_s29, %s2659_s28  ;;  %p91_p9 = scmp.eq.s32.totalorder %s2675_s19, 0 }
  0xe3   : > { %s3418_s5 = smov (%p52_p8, %s50_s5), 0  ;;  %p96_p1 = scmp.ne.s32.totalorder %s2659_s28, %s2655_s27 }
  0xe4   : > { %p3026_p4 = por %p91_p9, %p90_p7  ;;  %s80_s24 = ssub.s32 %s2671_s0, %s3418_s5 }
  0xe5   : > { %s3390_s18 = sadd.s32 4294967295, %s2675_s19   ;;  %p81_p3 = scmp.eq.s32.totalorder %s80_s24, 0 }
  0xe6   : > { %p458_p6 = scmp.eq.s32.totalorder %s3390_s18, 1  ;;  %p3391_p10 = scmp.ne.s32.totalorder %s3382_s20, 0 }
  0xe7   : > { %p464_p13 = scmp.eq.s32.totalorder %s1916_s23, 1  ;;  %p2203_p2 = scmp.lt.s32.totalorder %s2675_s19, 2 }
  0xe8   : > { %p3038_p11 = por %p3391_p10, %p96_p1  ;;  %p3042_p12 = por %p458_p6, %p90_p7 }
  0xe9   : > { %s3047_s10 = scalar_select %p81_p3, %s2663_s29, %s83_s25  }
  0xea   : > { %s3393_s4 = scalar_select %p3042_p12, 1, 0 }
  0xeb   : > { %p3049_p0 = por %p464_p13, %p96_p1  ;;  %s605_s26 = sand.u32 1, %s2663_s29  }
  0xec   : > { %s1927_s22 = sshll.u32 %s2671_s0, 4  ;;  %s3395_s14 = sld [smem:[#allocation28_spill]] }
  0xed   : > { %s3394_s1 = scalar_select %p3049_p0, 1, 0 }
  0xee   : > { %s608_s24 = scalar_lea.vmem [#allocation5], %s605_s26  ;;  %p3065_p5 = pnand %p2203_p2, %p3026_p4 }
  0xef   : > { %s615_s23 = sshll.u32 %s608_s24, 4  ;;  %s606_s18 = scalar_lea.sflag [#allocation6], %s605_s26  ;;  %s3061_s23 = int_to_ptr.vmem [resolvable:$true] %s615_s23 }
  0xf0   : > { %p2549_p7 = pneg %p3065_p5 }
  0xf2   : > { %s3059_s16 = scalar_lea.hbm %s3395_s14, %s1927_s22  ;;  %s2552_s3 = scalar_lea.hbm %s3395_s14, 32 }
  0xf3   : > { %s2547_s7 = scalar_lea.hbm %s3059_s16, 16  ;;  %p2553_p4 = scmp.lt.u32.totalorder %s3059_s16, %s3395_s14 }
  0xf4   : > { %p2548_p8 = scmp.ne.s32.totalorder %s3059_s16, %s2547_s7  ;;  %p2554_p6 = scmp.lt.u32.totalorder %s2552_s3, %s2547_s7 }
  0xf5   : > { %p2556_p10 = scmp.lt.u32.totalorder %s2547_s7, %s3059_s16 }
  0xf6   : > { %p2550_p9 = pnand %p2549_p7, %p2548_p8  ;;  %p2555_p3 = por %p2554_p6, %p2553_p4 }
  0xf8   : > { %p2551_p1 = pneg %p2550_p9  ;;  %p2557_p13 = por %p2556_p10, %p2555_p3 }
  0xfa   : > { %p2558_p2 = pnand %p2557_p13, %p2551_p1 }
  0xfc   : > { %2561 = shalt.err (!%p2558_p2)
}
  0xfd   : > { %s2562_s26 = scalar_lea.vmem %s3061_s23, 16  ;;  %s2687_s22 = smov [#allocation5]  }
  0xfe   : > { %p2563_p8 = scmp.ne.s32.totalorder %s3061_s23, %s2562_s26  ;;  %s2567_s15 = sshll.u32 %s2687_s22, 4  ;;  %s2568_s15 = int_to_ptr.vmem [resolvable:$false] %s2567_s15 }
  0xff   : > { %s2569_s17 = scalar_lea.vmem %s2568_s15, 32  ;;  %p2570_p12 = scmp.lt.s32.totalorder %s3061_s23, %s2568_s15 }
 0x100   : > { %p2565_p9 = pnand %p2563_p8, %p2549_p7  ;;  %p2571_p4 = scmp.lt.s32.totalorder %s2569_s17, %s2562_s26 }
 0x102   : > { %p2566_p0 = pneg %p2565_p9  ;;  %p2572_p6 = por %p2571_p4, %p2570_p12 }
 0x104   : > { %p2573_p3 = pnand %p2572_p6, %p2566_p0 }
 0x106   : > { %2576 = shalt.err (!%p2573_p3)
}
 0x107   : > { %2190 = dma.hbm_to_vmem [thread:$0]  (!%p3065_p5), %s3059_s16, 16, %s3061_s23, %s606_s18  }
 0x108   : > { %p3397_p1 = scmp.ne.s32.totalorder %s3383_s21, 0 }
 0x109   : > { %s3097_s7 = sand.u32 (!%p3397_p1), 1, %s2659_s28  }
 0x10a   : > { %624 = sbr.rel (%p3397_p1) target bundleno = 2700 (0xa8c), region = 92  ;;  %s627_s3 = scalar_lea.sflag (!%p3397_p1), [#allocation6], %s3097_s7 }
 0x10b   : > { %s629_s24 = scalar_lea.vmem (!%p3397_p1), [#allocation5], %s3097_s7 }
 0x111   : > { %2630 = dma.done.wait (%p3038_p11), %s627_s3, 16  }
 0x112   : > { %2632 = vsyncadd (%p3038_p11), %s627_s3, 4294967280  ;;  %p3398_p12 = scmp.ne.s32.totalorder %s3382_s20, 0 }
 0x114   : > { %2634 = dma.done.wait (%p3398_p12), [#allocation9], 32  }
 0x115   : > { %2636 = vsyncadd (%p3398_p12), [#allocation9], 4294967264 }
 0x116   : > { %2638 = dma.done.wait (%p3398_p12), [#allocation12], 272  }
 0x117   : > { %2640 = vsyncadd (%p3398_p12), [#allocation12], 4294967024 }
 0x118   : > { %2642 = dma.done.wait (%p3398_p12), [#allocation15], 32  }
 0x119   : > { %2644 = vsyncadd (%p3398_p12), [#allocation15], 4294967264 }
 0x11a   : > { %2646 = dma.done.wait (%p3398_p12), [#allocation18], 32  }
 0x11b   : > { %2648 = vsyncadd (%p3398_p12), [#allocation18], 4294967264  ;;  %p717_p11 = scmp.lt.s32.totalorder %s2667_s30, 1  ;;  %s3399_s25 = sld [smem:[#allocation27_spill]]  ;;  %vm725_vm0 = vcmask 261120   ;;  %v2280_v13 = vld [vmem:[#allocation13] sm:$0xff]  }
 0x11c   : > { %s3400_s6 = sld [smem:[#allocation33_spill]]  ;;  %v2688_v14 = vmov 0.0   ;;  %v2282_v16 = vld [vmem:[#allocation13 + $0x8] sm:$0xff]   ;;  %vm2689_vm1 = vmmov 0   ;;  %v1940_v36 = vld [vmem:[#allocation8] ss:$0 sm:$0xff] }
 0x11d   : > { %s718_s21 = scalar_select %p717_p11, %s2667_s30, 1  ;;  %2026 = vmatprep.subr.bf16.mxu0 %v2688_v14  ;;  %2034 = vmatprep.subr.bf16.mxu1 %v2688_v14  ;;  %v1941_v47 = vld [vmem:[#allocation11] ss:$0 sm:$0xff]  ;;  %v1945_v48 = vld [vmem:[#allocation14] ss:$0 sm:$0xff]  ;;  %vm829_vm6 = vcmask 257024  }
 0x11e   : > { %2035 = vmatpush3.bf16.msra.mxu1 %v2280_v13  ;;  %2030 = vmatprep.mubr.msk.bf16.mxu0 %vm2689_vm1, %v2688_v14  ;;  %s3402_s23 = sld [smem:[#allocation31_spill]]  ;;  %v1950_v61 = vld [vmem:[#allocation10] ss:$0 sm:$0xff]  ;;  %vm1002_vm7 = vcmask 64512   ;;  %vm1062_vm8 = vcmask 1043456   ;;  %s2690_s20 = smov 120  }
 0x11f   : > { %s1938_s2 = sshll.u32 %s718_s21, 3  ;;  %2036 = vmatprep.subr.bf16.mxu1 %v2688_v14  ;;  %2038 = vmatprep.mubr.msk.bf16.mxu1 %vm2689_vm1, %v2688_v14  ;;  %s3401_s21 = sld [smem:[#allocation29_spill]]  ;;  %vm1109_vm9 = vcmask 60416   ;;  %vm1235_vm10 = vcmask 126016   ;;  %vm1354_vm11 = vcmask 191616   ;;  %vm1473_vm12 = vcmask 257216  }
 0x120   : > { %s2691_s26 = smov 104   ;;  %s2692_s22 = smov 112   ;;  %vm1688_vm15 = vcmask 523264  }
 0x121   : > { %s720_s18 = scalar_lea.vmem %s3399_s25, %s1938_s2  ;;  %s3403_s3 = sld [smem:[#allocation35_spill]] }
 0x122   : > { %v3126_v0 = vld [vmem:[%s720_s18] sm:$0xff]  ;;  %v2281_v15 = vld [vmem:[%s3400_s6 + $0x8] sm:$0xff]   ;;  %2037 = vmatpush3.bf16.msra.mxu1 %v2282_v16  ;;  %s2694_s16 = smov 16   ;;  %s2695_s25 = smov 24  }
 0x123   : > { %v726_v1 = vsel %vm725_vm0, %v3126_v0, 0.0  ;;  %v2279_v12 = vld [vmem:[%s3400_s6] sm:$0xff]   ;;  %2050 = vmatprep.subr.bf16.mxu1 %v2688_v14  ;;  %s3406_s17 = sld [smem:[#allocation37_spill]]  ;;  %s1937_s2 = sshll.u32 %s3097_s7, 3 }
 0x124   : > { %727 = vadd.xlane.f32.xlu0 %v726_v1  ;;  %2027 = vmatpush3.bf16.msra.mxu0 %v2279_v12  ;;  %v2283_v41 = vld [vmem:[%s3402_s23] sm:$0xff]   ;;  %v2284_v44 = vld [vmem:[%s3402_s23 + $0x8] sm:$0xff]   ;;  %s3407_s18 = sld [smem:[#allocation39_spill]]  ;;  %p3409_p5 = scmp.ne.s32.totalorder %s3393_s4, 0 }
 0x125   : > { %2028 = vmatprep.subr.bf16.mxu0 %v2688_v14  ;;  %v1939_v34 = vld [vmem:[%s3401_s21] ss:$0 sm:$0xff]  ;;  %s3405_s21 = sld [smem:[#allocation38_spill]] }
 0x128   : > { %903 = vadd.xlane.f32.xlu0 %v726_v1  ;;  %2029 = vmatpush3.bf16.msra.mxu0 %v2281_v15 }
 0x129   : > { %2042 = vmatprep.subr.bf16.mxu0 %v2688_v14 }
 0x1b1   : > { %v728_v2 = vpop.xlane.xlu0 %727 }
 0x1b2   : > { %v729_v3 = vmul.f32 0.03125, %v728_v2 }
 0x1b4   : > { %v730_v4 = vsub.f32 %v3126_v0, %v729_v3 }
 0x1b5   : > { %v904_v5 = vpop.xlane.xlu0 %903 }
 0x1b6   : > { %v905_v6 = vmul.f32 0.03125, %v904_v5  ;;  %v731_v7 = vmul.f32 %v730_v4, %v730_v4 }
 0x1b8   : > { %v906_v8 = vsub.f32 %v3126_v0, %v905_v6  ;;  %v732_v9 = vsel %vm725_vm0, %v731_v7, 0.0 }
 0x1b9   : > { %733 = vadd.xlane.f32.xlu1 %v732_v9 }
 0x1ba   : > { %v907_v10 = vmul.f32 %v906_v8, %v906_v8 }
 0x1bc   : > { %v908_v11 = vsel %vm725_vm0, %v907_v10, 0.0 }
 0x1bd   : > { %909 = vadd.xlane.f32.xlu1 %v908_v11 }
 0x246   : > { %v734_v17 = vpop.xlane.xlu1 %733 }
 0x247   : > { %v735_v18 = vmul.f32 0.032258064, %v734_v17 }
 0x249   : > { %2295 = vrsqrt.f32 %v735_v18  ;;  %vm738_vm2 = vcmp.eq.f32.partialorder %v735_v18, inf  ;;  %v741_v23 = vand.u32 2147483648, %v735_v18  ;;  %vm740_vm3 = vcmp.eq.f32.partialorder %v735_v18, 0.0 }
 0x24a   : > { %v910_v19 = vpop.xlane.xlu1 %909 }
 0x24b   : > { %v911_v20 = vmul.f32 0.032258064, %v910_v19 }
 0x24d   : > { %2297 = vrsqrt.f32 %v911_v20  ;;  %vm914_vm4 = vcmp.eq.f32.partialorder %v911_v20, inf  ;;  %v917_v29 = vand.u32 2147483648, %v911_v20  ;;  %vm916_vm5 = vcmp.eq.f32.partialorder %v911_v20, 0.0 }
 0x253   : > { %v2296_v21 = vpop.eup %2295 }
 0x254   : > { %v737_v22 = vmul.f32 %v2296_v21, %v735_v18  ;;  %v997_v21 = vlaneseq }
 0x256   : > { %v739_v24 = vsel %vm738_vm2, %v735_v18, %v737_v22  ;;  %v899_v22 = vld [vmem:[%s629_s24] sm:$0x1]  ;;  %s2693_s24 = smov 8  }
 0x257   : > { %v2298_v25 = vpop.eup %2297  ;;  %v742_v26 = vsel %vm740_vm3, %v741_v23, %v739_v24  ;;  %v1949_v23 = vadd.f32 -1.0, %v899_v22  ;;  %v998_v24 = vshrl.u32 %v997_v21, 7 }
 0x258   : > { %v743_v27 = vadd.f32 1e-06, %v742_v26  ;;  %v913_v28 = vmul.f32 %v2298_v25, %v911_v20 }
 0x259   : > { %v901_v25 = vmul.f32 1e+09, %v1949_v23  ;;  %v999_v26 = vsub.s32 0, %v998_v24 }
 0x25a   : > { %2299 = vrcp.f32 %v743_v27  ;;  %v915_v30 = vsel %vm914_vm4, %v911_v20, %v913_v28 }
 0x25b   : > { %v918_v31 = vsel %vm916_vm5, %v917_v29, %v915_v30  ;;  %v1000_v27 = vrot.slane %v901_v25, %v999_v26 }
 0x25c   : > { %v919_v32 = vadd.f32 1e-06, %v918_v31 }
 0x25e   : > { %2301 = vrcp.f32 %v919_v32 }
 0x264   : > { %v2300_v33 = vpop.eup %2299 }
 0x265   : > { %v746_v35 = vmul.f32 %v2300_v33, %v730_v4 }
 0x267   : > { %v753_v37 = vmul.f32 %v1939_v34, %v746_v35 }
 0x268   : > { %v2302_v38 = vpop.eup %2301 }
 0x269   : > { %v760_v39 = vadd.f32 %v1940_v36, %v753_v37  ;;  %v922_v40 = vmul.f32 %v2302_v38, %v906_v8 }
 0x26b   : > { %v761_v42 = vpack.c.bf16 %v760_v39, %v760_v39  ;;  %v923_v43 = vmul.f32 %v1939_v34, %v922_v40 }
 0x26d   : > { %2031 = vmatmul.mubr.msk.bf16.vlgmr.msra.gmra.mrb[0].mxu0 %vm725_vm0, %v761_v42  ;;  %2039 = vmatmul.mubr.msk.bf16.vlgmr.msra.gmra.mrb[0].mxu1 %vm725_vm0, %v761_v42  ;;  %v924_v45 = vadd.f32 %v1940_v36, %v923_v43 }
 0x26e   : > { %2043 = vmatpush3.bf16.msra.mxu0 %v2283_v41  ;;  %2046 = vmatprep.mubr.msk.bf16.mxu0 %vm2689_vm1, %v2688_v14 }
 0x26f   : > { %2044 = vmatprep.subr.bf16.mxu0 %v2688_v14  ;;  %2052 = vmatprep.mubr.msk.bf16.mxu1 %vm2689_vm1, %v2688_v14  ;;  %v925_v46 = vpack.c.bf16 %v924_v45, %v924_v45 }
 0x272   : > { %2045 = vmatpush3.bf16.msra.mxu0 %v2284_v44 }
 0x273   : > { %2056 = vmatprep.subr.bf16.mxu0 %v2688_v14 }
 0x275   : > { %2047 = vmatmul.mubr.msk.bf16.vlgmr.msra.gmra.mrb[4].mxu0 %vm725_vm0, %v925_v46 }
 0x276   : > { %2058 = vmatprep.mubr.msk.bf16.mxu0 %vm2689_vm1, %v2688_v14 }
 0x340   : > { %v822_v49 = vpop.f32.mrb[0].mxu0  ;;  %v888_v50 = vpop.f32.mrb[0].mxu1 }
 0x341   : > { %v823_v51 = vadd.f32 %v1941_v47, %v822_v49  ;;  %v889_v52 = vadd.f32 %v1945_v48, %v888_v50  ;;  %v2032_v53 = vpop.f32.mrb[1].mxu0  ;;  %v2040_v54 = vpop.f32.mrb[1].mxu1 }
 0x342   : > { %v825_v55 = vpop.f32.mrb[2].mxu0  ;;  %v891_v56 = vpop.f32.mrb[2].mxu1 }
 0x343   : > { %v828_v57 = vpack.c.bf16 %v823_v51, %v823_v51  ;;  %v894_v58 = vpack.c.bf16 %v889_v52, %v889_v52  ;;  %v2033_v59 = vpop.f32.mrb[3].mxu0  ;;  %v2041_v60 = vpop.f32.mrb[3].mxu1 }
 0x345   : > { %830 = vst.msk [vmem:[#allocation2] sm:$0xf] %vm829_vm6, %v828_v57  ;;  %895 = vst.msk [vmem:[#allocation3] sm:$0xf] %vm829_vm6, %v894_v58 }
 0x348   : > { %v986_v62 = vpop.f32.mrb[4].mxu0 }
 0x349   : > { %v987_v63 = vadd.f32 %v1950_v61, %v986_v62  ;;  %v2048_v1 = vpop.f32.mrb[5].mxu0 }
 0x34a   : > { %v989_v2 = vpop.f32.mrb[6].mxu0 }
 0x34b   : > { %v992_v3 = vmul.f32 0.35355338, %v987_v63  ;;  %v2049_v4 = vpop.f32.mrb[7].mxu0 }
 0x34c   : > { %v994_v5 = vld [vmem:[#allocation2] sm:$0xf]  ;;  %v3170_v6 = vld [vmem:[#allocation3] sm:$0xf] }
 0x34d   : > { %v993_v7 = vpack.c.bf16 %v992_v3, %v992_v3  ;;  %v1007_v8 = vsel %vm1002_vm7, %v994_v5, 0  ;;  %v1064_v9 = vsel %vm1062_vm8, %v3170_v6, 0  ;;  %v1956_v10 = vcombine.low %v994_v5, %v994_v5 }
 0x34e   : > { %2051 = vmatpush3.bf16.xpose.msra.mxu1 %v1007_v8  ;;  %2057 = vmatpush3.bf16.msra.mxu0 %v1064_v9  ;;  %v1958_v52 = vcombine.low %v3170_v6, %v3170_v6 }
 0x34f   : > { %1117 = vrot.lane.b32.xlu0 %v1956_v10, %s2690_s20  ;;  %1112 = vrot.lane.b32.xlu1 %v993_v7, %s2690_s20 }
 0x350   : > { %2062 = vmatprep.subr.bf16.mxu1 %v2688_v14  ;;  %2068 = vmatprep.subr.bf16.mxu0 %v2688_v14 }
 0x353   : > { %1358 = vrot.lane.b32.xlu0 %v1956_v10, %s2691_s26  ;;  %1239 = vrot.lane.b32.xlu1 %v1956_v10, %s2692_s22 }
 0x355   : > { %2053 = vmatmul.mubr.msk.bf16.vlgmr.msra.gmra.mrb[4].mxu1 %vm1002_vm7, %v993_v7 }
 0x356   : > { %2064 = vmatprep.mubr.msk.bf16.mxu1 %vm2689_vm1, %v2688_v14 }
 0x357   : > { %1237 = vrot.lane.b32.xlu1 %v993_v7, %s2692_s22 }
 0x35b   : > { %1356 = vrot.lane.b32.xlu1 %v993_v7, %s2691_s26 }
 0x3c1   : > { %v1118_v11 = vpop.permute.xlu0 %1117  ;;  %v1113_v12 = vpop.permute.xlu1 %1112 }
 0x3c2   : > { %v1123_v13 = vsel %vm1002_vm7, %v1118_v11, 0 }
 0x3c3   : > { %2063 = vmatpush3.bf16.xpose.msra.mxu1 %v1123_v13 }
 0x3c4   : > { %2074 = vmatprep.subr.bf16.mxu1 %v2688_v14 }
 0x3c5   : > { %v1240_v15 = vpop.permute.xlu1 %1239  ;;  %v1359_v17 = vpop.permute.xlu0 %1358 }
 0x3c6   : > { %v1245_v16 = vsel %vm1002_vm7, %v1240_v15, 0  ;;  %v1364_v19 = vsel %vm1002_vm7, %v1359_v17, 0 }
 0x3c9   : > { %v1238_v18 = vpop.permute.xlu1 %1237 }
 0x3ca   : > { %2065 = vmatmul.mubr.msk.bf16.vlgmr.msra.gmra.mrb[8].mxu1 %vm1002_vm7, %v1113_v12 }
 0x3cb   : > { %2075 = vmatpush3.bf16.xpose.msra.mxu1 %v1245_v16  ;;  %2076 = vmatprep.mubr.msk.bf16.mxu1 %vm2689_vm1, %v2688_v14 }
 0x3cc   : > { %2086 = vmatprep.subr.bf16.mxu1 %v2688_v14 }
 0x3cd   : > { %v1357_v20 = vpop.permute.xlu1 %1356 }
 0x3d2   : > { %2077 = vmatmul.mubr.msk.bf16.vlgmr.msra.gmra.mrb[12].mxu1 %vm1002_vm7, %v1238_v18 }
 0x3d3   : > { %2087 = vmatpush3.bf16.xpose.msra.mxu1 %v1364_v19  ;;  %2088 = vmatprep.mubr.msk.bf16.mxu1 %vm2689_vm1, %v2688_v14 }
 0x3d4   : > { %2098 = vmatprep.subr.bf16.mxu1 %v2688_v14 }
 0x3da   : > { %2089 = vmatmul.mubr.msk.bf16.vlgmr.msra.gmra.mrb[16].mxu1 %vm1002_vm7, %v1357_v20 }
 0x3db   : > { %2102 = vmatprep.mubr.msk.bf16.mxu1 %vm2689_vm1, %v2688_v14 }
 0x428   : > { %v1043_v28 = vpop.f32.mrb[4].mxu1 }
 0x429   : > { %v1044_v29 = vadd.f32 %v1043_v28, %v1000_v27  ;;  %v2054_v30 = vpop.f32.mrb[5].mxu1 }
 0x42a   : > { %v1046_v31 = vpop.f32.mrb[6].mxu1 }
 0x42b   : > { %v2055_v32 = vpop.f32.mrb[7].mxu1  ;;  %v1049_v33 = vsel %vm1002_vm7, %v1044_v29, -inf }
 0x42c   : > { %1050 = vmax.xlane.f32.xlu0 %v1049_v33 }
 0x49d   : > { %v1159_v34 = vpop.f32.mrb[8].mxu1 }
 0x49e   : > { %v1160_v35 = vadd.f32 %v1159_v34, %v1000_v27  ;;  %v2066_v36 = vpop.f32.mrb[9].mxu1 }
 0x49f   : > { %v1162_v37 = vpop.f32.mrb[10].mxu1 }
 0x4a0   : > { %v2067_v38 = vpop.f32.mrb[11].mxu1  ;;  %v1165_v39 = vsel %vm1002_vm7, %v1160_v35, -inf }
 0x4a1   : > { %1166 = vmax.xlane.f32.xlu1 %v1165_v39 }
 0x4a5   : > { %v1281_v40 = vpop.f32.mrb[12].mxu1 }
 0x4a6   : > { %v1282_v41 = vadd.f32 %v1281_v40, %v1000_v27  ;;  %v2078_v42 = vpop.f32.mrb[13].mxu1 }
 0x4a7   : > { %v1284_v43 = vpop.f32.mrb[14].mxu1 }
 0x4a8   : > { %v2079_v44 = vpop.f32.mrb[15].mxu1  ;;  %v1287_v45 = vsel %vm1002_vm7, %v1282_v41, -inf }
 0x4a9   : > { %1288 = vmax.xlane.f32.xlu0 %v1287_v45  ;;  %v2288_v45 = vld [vmem:[%s3403_s3 + $0x8] sm:$0xff]  }
 0x4ad   : > { %v1400_v46 = vpop.f32.mrb[16].mxu1 }
 0x4ae   : > { %v1401_v47 = vadd.f32 %v1400_v46, %v1000_v27  ;;  %v2090_v48 = vpop.f32.mrb[17].mxu1 }
 0x4af   : > { %v1403_v49 = vpop.f32.mrb[18].mxu1 }
 0x4b0   : > { %v2091_v50 = vpop.f32.mrb[19].mxu1  ;;  %v1406_v51 = vsel %vm1002_vm7, %v1401_v47, -inf }
 0x4b1   : > { %1407 = vmax.xlane.f32.xlu0 %v1406_v51 }
 0x4b2   : > { %1297 = vrot.lane.b32.xlu1 %v1958_v52, %s2692_s22  ;;  %s716_s22 = scalar_lea.vmem [#allocation20], %s1937_s2 }
 0x4b6   : > { %1416 = vrot.lane.b32.xlu1 %v1958_v52, %s2691_s26  ;;  %s3404_s26 = sld [smem:[#allocation36_spill]] }
 0x4b9   : > { %v1051_v53 = vpop.xlane.xlu0 %1050 }
 0x4ba   : > { %v1052_v54 = vsub.f32 %v1044_v29, %v1051_v53 }
 0x4bc   : > { %v1053_v55 = vmul.f32 1.442695, %v1052_v54 }
 0x4be   : > { %2303 = vpow2.f32 %v1053_v55 }
 0x4c7   : > { %1178 = vrot.lane.b32.xlu0 %v1958_v52, %s2690_s20  ;;  %s1984_s20 = sshll.u32 %s2667_s30, 7  ;;  %s1735_s30 = scalar_lea.sflag [#allocation7], %s3097_s7 }
 0x4c8   : > { %v2304_v56 = vpop.eup %2303 }
 0x4c9   : > { %v1058_v57 = vpack.c.bf16 %v2304_v56, %v2304_v56  ;;  %v1055_v19 = vsel %vm1002_vm7, %v2304_v56, 0.0 }
 0x4cb   : > { %2059 = vmatmul.mubr.msk.bf16.vlgmr.msra.gmra.mrb[8].mxu0 %vm1002_vm7, %v1058_v57 }
 0x4cc   : > { %2070 = vmatprep.mubr.msk.bf16.mxu0 %vm2689_vm1, %v2688_v14 }
 0x52e   : > { %v1167_v58 = vpop.xlane.xlu1 %1166 }
 0x52f   : > { %v1168_v59 = vsub.f32 %v1160_v35, %v1167_v58 }
 0x531   : > { %v1169_v60 = vmul.f32 1.442695, %v1168_v59  ;;  %v1967_v59 = vld [vmem:[#allocation16] ss:$0 sm:$0xff] }
 0x532   : > { %v1298_v8 = vpop.permute.xlu1 %1297 }
 0x533   : > { %2305 = vpow2.f32 %v1169_v60  ;;  %v1303_v12 = vsel %vm1062_vm8, %v1298_v8, 0 }
 0x536   : > { %v1289_v61 = vpop.xlane.xlu0 %1288  ;;  %v1417_v13 = vpop.permute.xlu1 %1416 }
 0x537   : > { %v1290_v62 = vsub.f32 %v1282_v41, %v1289_v61  ;;  %v1422_v18 = vsel %vm1062_vm8, %v1417_v13, 0  ;;  %v2287_v41 = vld [vmem:[%s3403_s3] sm:$0xff]   ;;  %s3408_s3 = sld [smem:[#allocation40_spill]] }
 0x538   : > { %2099 = vmatpush3.bf16.msra.mxu1 %v2287_v41 }
 0x539   : > { %v1291_v63 = vmul.f32 1.442695, %v1290_v62  ;;  %2100 = vmatprep.subr.bf16.mxu1 %v2688_v14 }
 0x53b   : > { %2307 = vpow2.f32 %v1291_v63 }
 0x53c   : > { %2101 = vmatpush3.bf16.msra.mxu1 %v2288_v45 }
 0x53d   : > { %v2306_v1 = vpop.eup %2305  ;;  %2114 = vmatprep.subr.bf16.mxu1 %v2688_v14  ;;  %s3287_s6 = scalar_lea.hbm %s3408_s3, %s1984_s20 }
 0x53e   : > { %v1408_v2 = vpop.xlane.xlu0 %1407  ;;  %v1171_v3 = vsel %vm1002_vm7, %v2306_v1, 0.0  ;;  %v1174_v10 = vpack.c.bf16 %v2306_v1, %v2306_v1 }
 0x53f   : > { %v1409_v4 = vsub.f32 %v1401_v47, %v1408_v2  ;;  %1172 = vadd.xlane.f32.xlu1 %v1171_v3 }
 0x541   : > { %v1410_v5 = vmul.f32 1.442695, %v1409_v4 }
 0x542   : > { %v1179_v6 = vpop.permute.xlu0 %1178 }
 0x543   : > { %2309 = vpow2.f32 %v1410_v5  ;;  %v1184_v7 = vsel %vm1062_vm8, %v1179_v6, 0 }
 0x544   : > { %2069 = vmatpush3.bf16.msra.mxu0 %v1184_v7 }
 0x545   : > { %v2308_v9 = vpop.eup %2307  ;;  %2080 = vmatprep.subr.bf16.mxu0 %v2688_v14 }
 0x546   : > { %v1293_v11 = vsel %vm1002_vm7, %v2308_v9, 0.0  ;;  %v1296_v16 = vpack.c.bf16 %v2308_v9, %v2308_v9  ;;  %v2289_v9 = vld [vmem:[%s3404_s26] sm:$0xff]  }
 0x547   : > { %1294 = vadd.xlane.f32.xlu0 %v1293_v11  ;;  %2071 = vmatmul.mubr.msk.bf16.vlgmr.msra.gmra.mrb[12].mxu0 %vm1002_vm7, %v1174_v10  ;;  %v2291_v10 = vld [vmem:[%s3405_s21] sm:$0xff]   ;;  %v2292_v11 = vld [vmem:[%s3405_s21 + $0x8] sm:$0xff]  }
 0x548   : > { %2081 = vmatpush3.bf16.msra.mxu0 %v1303_v12  ;;  %2082 = vmatprep.mubr.msk.bf16.mxu0 %vm2689_vm1, %v2688_v14 }
 0x549   : > { %2092 = vmatprep.subr.bf16.mxu0 %v2688_v14 }
 0x54d   : > { %v2310_v15 = vpop.eup %2309 }
 0x54e   : > { %v1412_v17 = vsel %vm1002_vm7, %v2310_v15, 0.0  ;;  %v1415_v20 = vpack.c.bf16 %v2310_v15, %v2310_v15 }
 0x54f   : > { %1413 = vadd.xlane.f32.xlu0 %v1412_v17  ;;  %2083 = vmatmul.mubr.msk.bf16.vlgmr.msra.gmra.mrb[16].mxu0 %vm1002_vm7, %v1296_v16 }
 0x550   : > { %2093 = vmatpush3.bf16.msra.mxu0 %v1422_v18  ;;  %2094 = vmatprep.mubr.msk.bf16.mxu0 %vm2689_vm1, %v2688_v14 }
 0x551   : > { %2106 = vmatprep.subr.bf16.mxu0 %v2688_v14 }
 0x553   : > { %1056 = vadd.xlane.f32.xlu0 %v1055_v19 }
 0x557   : > { %2095 = vmatmul.mubr.msk.bf16.vlgmr.msra.gmra.mrb[20].mxu0 %vm1002_vm7, %v1415_v20 }
 0x558   : > { %2110 = vmatprep.mubr.msk.bf16.mxu0 %vm2689_vm1, %v2688_v14  ;;  %2107 = vmatpush3.bf16.msra.mxu0 %v2289_v9 }
 0x559   : > { %2108 = vmatprep.subr.bf16.mxu0 %v2688_v14 }
 0x59e   : > { %v1100_v21 = vpop.f32.mrb[8].mxu0 }
 0x59f   : > { %v2060_v22 = vpop.f32.mrb[9].mxu0 }
 0x5a0   : > { %v1103_v23 = vpop.f32.mrb[10].mxu0  ;;  %v1971_v22 = vld [vmem:[#allocation17] ss:$0 sm:$0xff] }
 0x5a1   : > { %v2061_v24 = vpop.f32.mrb[11].mxu0 }
 0x5a2   : > { %v1972_v24 = vld [vmem:[#allocation19] ss:$0 sm:$0xff] }
 0x5cc   : > { %v1173_v31 = vpop.xlane.xlu1 %1172 }
 0x5d4   : > { %v1295_v25 = vpop.xlane.xlu0 %1294 }
 0x5dc   : > { %v1414_v26 = vpop.xlane.xlu0 %1413 }
 0x5e0   : > { %v1057_v27 = vpop.xlane.xlu0 %1056 }
 0x5e1   : > { %2311 = vrcp.f32 %v1057_v27 }
 0x5e2   : > { %2313 = vrcp.f32 %v1173_v31 }
 0x5e3   : > { %2315 = vrcp.f32 %v1295_v25 }
 0x5e4   : > { %2317 = vrcp.f32 %v1414_v26 }
 0x5eb   : > { %v2312_v28 = vpop.eup %2311 }
 0x5ec   : > { %v1107_v29 = vmul.f32 %v2312_v28, %v1100_v21  ;;  %v2314_v32 = vpop.eup %2313  ;;  %v2293_v28 = vld [vmem:[%s3405_s21 + $0x10] sm:$0xff]  }
 0x5ed   : > { %v2316_v39 = vpop.eup %2315 }
 0x5ee   : > { %v1108_v30 = vpack.c.bf16 %v1107_v29, %v1107_v29  ;;  %v2318_v48 = vpop.eup %2317  ;;  %v2294_v29 = vld [vmem:[%s3405_s21 + $0x18] sm:$0xff]  }
 0x5f0   : > { %1110 = vst.msk [vmem:[#allocation4] sm:$0xf] %vm1109_vm9, %v1108_v30  ;;  %v1973_v30 = vld [vmem:[%s3406_s17] ss:$0 sm:$0xff] }
 0x61a   : > { %v1220_v33 = vpop.f32.mrb[12].mxu0 }
 0x61b   : > { %v1227_v34 = vmul.f32 %v2314_v32, %v1220_v33  ;;  %v2072_v35 = vpop.f32.mrb[13].mxu0 }
 0x61c   : > { %v1223_v36 = vpop.f32.mrb[14].mxu0 }
 0x61d   : > { %v1987_v37 = vpack.c.bf16 %v1227_v34, %v1227_v34  ;;  %v2073_v38 = vpop.f32.mrb[15].mxu0 }
 0x61f   : > { %1232 = vrot.lane.b32.xlu1 %v1987_v37, %s2693_s24  ;;  %s1749_s24 = sshll.u32 %s716_s22, 4  ;;  %s3289_s24 = int_to_ptr.vmem [resolvable:$true] %s1749_s24 }
 0x620   : > { %s2577_s2 = scalar_lea.vmem %s3289_s24, 128 }
 0x621   : > { %p2578_p0 = scmp.ne.s32.totalorder %s3289_s24, %s2577_s2 }
 0x622   : > { %v1339_v40 = vpop.f32.mrb[16].mxu0 }
 0x623   : > { %v1346_v42 = vmul.f32 %v2316_v39, %v1339_v40  ;;  %v2084_v43 = vpop.f32.mrb[17].mxu0  ;;  %p2579_p7 = pnand %p2578_p0, %p3409_p5 }
 0x624   : > { %v1342_v44 = vpop.f32.mrb[18].mxu0 }
 0x625   : > { %v1988_v46 = vpack.c.bf16 %v1346_v42, %v1346_v42  ;;  %v2085_v47 = vpop.f32.mrb[19].mxu0  ;;  %p2580_p10 = pneg %p2579_p7 }
 0x627   : > { %1351 = vrot.lane.b32.xlu0 %v1988_v46, %s2694_s16  ;;  %s2696_s16 = smov [#allocation20]  }
 0x62a   : > { %v1458_v49 = vpop.f32.mrb[20].mxu0 }
 0x62b   : > { %v1465_v50 = vmul.f32 %v2318_v48, %v1458_v49  ;;  %v2096_v51 = vpop.f32.mrb[21].mxu0 }
 0x62c   : > { %v1461_v52 = vpop.f32.mrb[22].mxu0 }
 0x62d   : > { %v1989_v53 = vpack.c.bf16 %v1465_v50, %v1465_v50  ;;  %v2097_v54 = vpop.f32.mrb[23].mxu0 }
 0x62f   : > { %1470 = vrot.lane.b32.xlu1 %v1989_v53, %s2695_s25  ;;  %s2581_s25 = sshll.u32 %s2696_s16, 4  ;;  %s2582_s25 = int_to_ptr.vmem [resolvable:$false] %s2581_s25 }
 0x630   : > { %p2584_p13 = scmp.lt.s32.totalorder %s3289_s24, %s2582_s25 }
 0x691   : > { %v1233_v55 = vpop.permute.xlu1 %1232 }
 0x692   : > { %1236 = vst.msk [vmem:[#allocation4] sm:$0xf] %vm1235_vm10, %v1233_v55 }
 0x699   : > { %v1352_v56 = vpop.permute.xlu0 %1351 }
 0x69a   : > { %1355 = vst.msk [vmem:[#allocation4] sm:$0xf] %vm1354_vm11, %v1352_v56 }
 0x6a1   : > { %v1471_v57 = vpop.permute.xlu1 %1470 }
 0x6a2   : > { %1474 = vst.msk [vmem:[#allocation4] sm:$0xf] %vm1473_vm12, %v1471_v57 }
 0x6a9   : > { %v1475_v58 = vld [vmem:[#allocation4] sm:$0xf] }
 0x6aa   : > { %2103 = vmatmul.mubr.msk.bf16.vlgmr.msra.gmra.mrb[20].mxu1 %vm725_vm0, %v1475_v58 }
 0x6ab   : > { %2122 = vmatprep.mubr.msk.bf16.mxu1 %vm2689_vm1, %v2688_v14  ;;  %2115 = vmatpush3.bf16.msra.mxu1 %v2291_v10 }
 0x6ac   : > { %2116 = vmatprep.subr.bf16.mxu1 %v2688_v14 }
 0x6af   : > { %2117 = vmatpush3.bf16.msra.mxu1 %v2292_v11 }
 0x6b0   : > { %2118 = vmatprep.subr.bf16.mxu1 %v2688_v14 }
 0x6b3   : > { %2119 = vmatpush3.bf16.msra.mxu1 %v2293_v28 }
 0x6b4   : > { %2120 = vmatprep.subr.bf16.mxu1 %v2688_v14  ;;  %v1977_v14 = vld [vmem:[%s3407_s18] ss:$0 sm:$0xff]  ;;  %s2583_s18 = scalar_lea.vmem %s2582_s25, 256 }
 0x6b5   : > { %p2585_p2 = scmp.lt.s32.totalorder %s2583_s18, %s2577_s2 }
 0x6b7   : > { %2121 = vmatpush3.bf16.msra.mxu1 %v2294_v29  ;;  %p2586_p8 = por %p2585_p2, %p2584_p13 }
 0x6b9   : > { %p2587_p9 = pnand %p2586_p8, %p2580_p10 }
 0x77d   : > { %v1536_v60 = vpop.f32.mrb[20].mxu1 }
 0x77e   : > { %v1537_v61 = vadd.f32 %v1967_v59, %v1536_v60  ;;  %v2104_v62 = vpop.f32.mrb[21].mxu1 }
 0x77f   : > { %v1539_v63 = vpop.f32.mrb[22].mxu1 }
 0x780   : > { %v3246_v1 = vadd.f32 %v1537_v61, %v3126_v0  ;;  %v2105_v2 = vpop.f32.mrb[23].mxu1  ;;  %v2290_v0 = vld [vmem:[%s3404_s26 + $0x8] sm:$0xff]  }
 0x781   : > { %2109 = vmatpush3.bf16.msra.mxu0 %v2290_v0 }
 0x782   : > { %v1545_v3 = vsel %vm725_vm0, %v3246_v1, 0.0 }
 0x783   : > { %1546 = vadd.xlane.f32.xlu1 %v1545_v3 }
 0x810   : > { %v1547_v4 = vpop.xlane.xlu1 %1546 }
 0x811   : > { %v1548_v5 = vmul.f32 0.03125, %v1547_v4 }
 0x813   : > { %v1549_v6 = vsub.f32 %v3246_v1, %v1548_v5 }
 0x815   : > { %v1550_v7 = vmul.f32 %v1549_v6, %v1549_v6 }
 0x817   : > { %v1551_v8 = vsel %vm725_vm0, %v1550_v7, 0.0 }
 0x818   : > { %1552 = vadd.xlane.f32.xlu0 %v1551_v8 }
 0x8a5   : > { %v1553_v12 = vpop.xlane.xlu0 %1552 }
 0x8a6   : > { %v1554_v13 = vmul.f32 0.032258064, %v1553_v12 }
 0x8a8   : > { %2319 = vrsqrt.f32 %v1554_v13  ;;  %vm1557_vm13 = vcmp.eq.f32.partialorder %v1554_v13, inf  ;;  %v1560_v17 = vand.u32 2147483648, %v1554_v13  ;;  %vm1559_vm14 = vcmp.eq.f32.partialorder %v1554_v13, 0.0 }
 0x8b2   : > { %v2320_v15 = vpop.eup %2319 }
 0x8b3   : > { %v1556_v16 = vmul.f32 %v2320_v15, %v1554_v13 }
 0x8b5   : > { %v1558_v18 = vsel %vm1557_vm13, %v1554_v13, %v1556_v16 }
 0x8b6   : > { %v1561_v19 = vsel %vm1559_vm14, %v1560_v17, %v1558_v18 }
 0x8b7   : > { %v1562_v20 = vadd.f32 1e-06, %v1561_v19 }
 0x8b9   : > { %2321 = vrcp.f32 %v1562_v20 }
 0x8c3   : > { %v2322_v21 = vpop.eup %2321 }
 0x8c4   : > { %v1565_v23 = vmul.f32 %v2322_v21, %v1549_v6 }
 0x8c6   : > { %v1572_v25 = vmul.f32 %v1971_v22, %v1565_v23 }
 0x8c8   : > { %v1579_v26 = vadd.f32 %v1972_v24, %v1572_v25 }
 0x8ca   : > { %v1580_v27 = vpack.c.bf16 %v1579_v26, %v1579_v26 }
 0x8cc   : > { %2111 = vmatmul.mubr.msk.bf16.vlgmr.msra.gmra.mrb[24].mxu0 %vm725_vm0, %v1580_v27 }
 0x99f   : > { %v1641_v31 = vpop.f32.mrb[24].mxu0 }
 0x9a0   : > { %v1642_v32 = vadd.f32 %v1973_v30, %v1641_v31  ;;  %v2112_v33 = vpop.f32.mrb[25].mxu0 }
 0x9a1   : > { %v1644_v34 = vpop.f32.mrb[26].mxu0 }
 0x9a2   : > { %v1647_v35 = vmax.f32 %v1642_v32, 0.0  ;;  %v2113_v36 = vpop.f32.mrb[27].mxu0 }
 0x9a4   : > { %v1648_v37 = vpack.c.bf16 %v1647_v35, %v1647_v35 }
 0x9a6   : > { %2123 = vmatmul.mubr.msk.bf16.vlgmr.msra.gmra.mrb[24].mxu1 %vm1688_vm15, %v1648_v37 }
 0xa79   : > { %v1726_v38 = vpop.f32.mrb[24].mxu1 }
 0xa7a   : > { %v1727_v39 = vadd.f32 %v1977_v14, %v1726_v38  ;;  %v2124_v40 = vpop.f32.mrb[25].mxu1 }
 0xa7b   : > { %v1729_v41 = vpop.f32.mrb[26].mxu1 }
 0xa7c   : > { %v1732_v42 = vadd.f32 %v1727_v39, %v3246_v1  ;;  %v2125_v43 = vpop.f32.mrb[27].mxu1 }
 0xa7e   : > { %1733 = vst.msk [vmem:[%s716_s22] sm:$0xff] %vm725_vm0, %v1732_v42 }
 0xa7f   : > { %2590 = shalt.err (!%p2587_p9)
}
 0xa80   : > { %s2591_s7 = scalar_lea.hbm %s3287_s6, 128  ;;  %s2595_s15 = scalar_lea.hbm %s3408_s3, 256 }
 0xa81   : > { %p2592_p4 = scmp.ne.s32.totalorder %s3287_s6, %s2591_s7  ;;  %p2596_p1 = scmp.lt.u32.totalorder %s3287_s6, %s3408_s3 }
 0xa82   : > { %p2597_p12 = scmp.lt.u32.totalorder %s2595_s15, %s2591_s7  ;;  %p2599_p0 = scmp.lt.u32.totalorder %s2591_s7, %s3287_s6 }
 0xa83   : > { %p2593_p6 = pnand %p2592_p4, %p3409_p5 }
 0xa84   : > { %p2598_p11 = por %p2597_p12, %p2596_p1 }
 0xa85   : > { %p2594_p3 = pneg %p2593_p6 }
 0xa86   : > { %p2600_p7 = por %p2599_p0, %p2598_p11 }
 0xa88   : > { %p2601_p10 = pnand %p2600_p7, %p2594_p3 }
 0xa8a   : > { %2604 = shalt.err (!%p2601_p10)
}
 0xa8b   : > { %2160 = dma.vmem_to_hbm [thread:$0]  (%p3409_p5), %s3289_s24, 128, %s3287_s6, %s1735_s30  }
 0xa8c PF: > { %s1761_s2 = sand.u32 1, %s2655_s27   ;;  %p3410_p13 = scmp.ne.s32.totalorder %s3394_s1, 0 }
 0xa8d   : > { %p3411_p2 = scmp.ge.s32.totalorder %s2675_s19, 2  ;;  %s1762_s25 = scalar_lea.sflag [#allocation7], %s1761_s2 }
 0xa8f   : > { %p2192_p8 = pnand %p3411_p2, %p3410_p13 }
 0xa91   : > { %2650 = dma.done.wait (!%p2192_p8), %s1762_s25, 128  }
 0xa92   : > { %2652 = vsyncadd (!%p2192_p8), %s1762_s25, 4294967168  ;;  %s38_s19 = sadd.s32 1, %s2675_s19   ;;  %s3412_s27 = smov %s2659_s28 }
 0xa93   : > { %p35_p9 = scmp.ge.s32.totalorder %s38_s19, 4   ;;  %s3413_s28 = smov %s2663_s29 }
 0xa94   : > { %s3414_s29 = smov %s3047_s10  ;;  %s3415_s30 = smov %s2671_s0 }
 0xa95   : > { %s3416_s0 = smov %s3418_s5  ;;  %37 = sbr.rel (!%p35_p9) target bundleno = 25 (0x19), region = 173 }
 0xa9c   :  { %1767 = vsyncpa [#allocation6], 1 }
 0xa9d   :  { %1769 = vsyncpa [#allocation6 + $0x1], 1 }
 0xa9e   :  { %1770 = vsyncpa [#allocation9], 1 }
 0xa9f   :  { %1771 = vsyncpa [#allocation12], 1 }
 0xaa0   :  { %1772 = vsyncpa [#allocation15], 1 }
 0xaa1   :  { %1773 = vsyncpa [#allocation18], 1 }
 0xaa2   :  { %1774 = vsyncpa [#allocation7], 1 }
 0xaa3   :  { %1776 = vsyncpa [#allocation7 + $0x1], 1 }

</bundles_post_ra>
